<compile_context>
chip_gen: v5e
topology: v5e:2x2
jax: 0.10.0
libtpu: 0.0.40
codegen_flags: <defaults>
</compile_context>

<pallas_src>
import functools
import math

import jax
import jax.numpy as jnp
from jax.experimental import pallas as pl
from jax.experimental.pallas import tpu as pltpu


# ----------------------------------------------------------------------------
# Fused Pallas kernel
# ----------------------------------------------------------------------------
def _hopfield_kernel(h_ref, g_ref, be_ref, wqkv_ref, bqkv_ref, wo_ref, bo_ref,
                     out_ref, *, num_heads, head_dim, hidden_size, beta,
                     update_steps, normalize, ln_eps, mxu_dtype, approx_recip):
    """Fused ModernHopfieldLayer forward for one batch element.

    h_ref     : (1, S, H)  input hidden states (also the residual), f32
    g_ref     : (1, H)     LayerNorm gamma (f32)
    be_ref    : (1, H)     LayerNorm beta  (f32)
    wqkv_ref  : (H, 3H)    packed [Wq | Wk | Wv] (in, out) layout, mxu_dtype
    bqkv_ref  : (1, 3H)    packed [bq | bk | bv], f32
    wo_ref    : (H, H)     output projection (in, out), mxu_dtype
    bo_ref    : (1, H)     output projection bias, f32
    out_ref   : (1, S, H)  f32
    """
    h = h_ref[0]                                              # [S, H] f32

    # ---- LayerNorm: stats in f32, rsqrt -> EUP slot -------------------------
    mu = jnp.mean(h, axis=-1, keepdims=True)
    xc = h - mu
    var = jnp.mean(xc * xc, axis=-1, keepdims=True)
    hn = xc * jax.lax.rsqrt(var + ln_eps) * g_ref[...] + be_ref[...]

    cast = lambda x: x.astype(mxu_dtype)
    H, hd = hidden_size, head_dim

    # ---- ONE wide fused Q|K|V projection: [S,H] @ [H,3H] -> [S,3H] ----------
    # f32 accumulation on the MXU; bias added post-accumulation in f32.
    qkv = jnp.dot(cast(hn), wqkv_ref[...],
                  preferred_element_type=jnp.float32) + bqkv_ref[...]

    # ---- per-head Hopfield retrieval ----------------------------------------
    head_states = []
    for hh in range(num_heads):                               # static unroll (nH small)
        q = qkv[:, hh * hd:(hh + 1) * hd]                     # [S, hd]
        k = qkv[:, H + hh * hd:H + (hh + 1) * hd]
        v = qkv[:, 2 * H + hh * hd:2 * H + (hh + 1) * hd]

        if normalize:
            # F.normalize(p=2, eps=1e-12): x / max(||x||, 1e-12)  (f32 math)
            q = q * jax.lax.rsqrt(
                jnp.maximum(jnp.sum(q * q, axis=-1, keepdims=True), 1e-24))
            k = k * jax.lax.rsqrt(
                jnp.maximum(jnp.sum(k * k, axis=-1, keepdims=True), 1e-24))

        # beta folded into the (fixed) keys once; K transposed ONCE, hoisted
        # out of the update loop so no per-iteration implicit RHS transpose.
        kT = cast(jnp.transpose(k * beta))                    # [hd, S]
        v = cast(v)

        state = q
        for _ in range(update_steps):                         # static unroll
            sim = jnp.dot(cast(state), kT,
                          preferred_element_type=jnp.float32)  # [S, S], already *beta
            m = jnp.max(sim, axis=-1, keepdims=True)          # f32 max-subtraction
            e = jnp.exp(sim - m)
            inv = pl.reciprocal(jnp.sum(e, axis=-1, keepdims=True),
                                approx=approx_recip)
            attn = e * inv
            state = jnp.dot(cast(attn), v, preferred_element_type=jnp.float32)
        head_states.append(state)

    # ---- ONE output projection over the full H contraction ------------------
    state_all = jnp.concatenate(head_states, axis=-1)         # [S, H] head-major
    o = jnp.dot(cast(state_all), wo_ref[...], preferred_element_type=jnp.float32)

    # Dropout is identity outside training; residual add fused here.
    out_ref[0] = (h + o + bo_ref[...]).astype(out_ref.dtype)


# ----------------------------------------------------------------------------
# pallas_call wrapper
# ----------------------------------------------------------------------------
def _vmem_limit_bytes(S, H, mxu_itemsize):
    f32 = 4
    io_blocks = 2 * 2 * S * H * f32                         # (1,S,H) in/out, dbl-buffered
    weights = (3 * H * H + H * H) * mxu_itemsize + 6 * H * f32
    interm = (3 * S * H + S * S + 6 * S * H) * f32          # qkv, sim, per-head temps
    est = 2 * (io_blocks + weights + interm)                 # 2x headroom
    return int(min(max(est, 32 * 2**20), 64 * 2**20))        # floor 32 MiB, cap 64 MiB (v7x)


def _const_spec(shape, single_buffer):
    n = len(shape)
    index_map = lambda bb: (0,) * n
    if single_buffer:
        # Constant across the batch grid -> one resident buffer is enough
        # (default double buffering would only double the weight VMEM).
        return pl.BlockSpec(shape, index_map, pipeline_mode=pl.Buffered(1))
    return pl.BlockSpec(shape, index_map)


def _hopfield_call(hidden_states, ln_g, ln_b, wqkv, bqkv, wo, bo, *,
                   num_heads, beta, update_steps, normalize, ln_eps,
                   mxu_dtype, single_buffer_weights):
    B, S, H = hidden_states.shape
    hd = H // num_heads
    low_precision = (mxu_dtype == jnp.bfloat16)

    kernel = functools.partial(
        _hopfield_kernel, num_heads=num_heads, head_dim=hd, hidden_size=H,
        beta=float(beta), update_steps=update_steps, normalize=normalize,
        ln_eps=ln_eps, mxu_dtype=mxu_dtype, approx_recip=low_precision)

    row_spec = pl.BlockSpec((1, S, H), lambda bb: (bb, 0, 0))
    sb = single_buffer_weights
    in_specs = [
        row_spec,                                            # hidden states
        _const_spec((1, H), sb), _const_spec((1, H), sb),    # LN gamma / beta
        _const_spec((H, 3 * H), sb),                         # Wqkv packed
        _const_spec((1, 3 * H), sb),                         # bqkv packed
        _const_spec((H, H), sb),                             # Wo
        _const_spec((1, H), sb),                             # bo
    ]
    itemsize = 2 if low_precision else 4

    return pl.pallas_call(
        kernel,
        out_shape=jax.ShapeDtypeStruct((B, S, H), jnp.float32),
        grid=(B,),
        in_specs=in_specs,
        out_specs=pl.BlockSpec((1, S, H), lambda bb: (bb, 0, 0)),
        compiler_params=pltpu.CompilerParams(
            dimension_semantics=("parallel",),               # B >= 2 -> both v7x TCs busy
            vmem_limit_bytes=_vmem_limit_bytes(S, H, itemsize)),
    )(hidden_states, ln_g, ln_b, wqkv, bqkv, wo, bo)


# Probe cache: does this JAX build accept pipeline_mode=pl.Buffered(1)?
_SINGLE_BUFFER_OK = [True]


def hopfield_forward_pallas(hidden_states, ln_g, ln_b, wqkv, bqkv, wo, bo, *,
                            num_heads, beta, update_steps, normalize,
                            ln_eps=1e-5, mxu_dtype=jnp.float32):
    kwargs = dict(num_heads=num_heads, beta=beta, update_steps=update_steps,
                  normalize=normalize, ln_eps=ln_eps, mxu_dtype=mxu_dtype)
    if _SINGLE_BUFFER_OK[0]:
        try:
            return _hopfield_call(hidden_states, ln_g, ln_b, wqkv, bqkv, wo, bo,
                                  single_buffer_weights=True, **kwargs)
        except Exception:
            # Older / different JAX build without BlockSpec pipeline_mode
            # support: fall back to default (double-buffered) weight blocks.
            _SINGLE_BUFFER_OK[0] = False
    return _hopfield_call(hidden_states, ln_g, ln_b, wqkv, bqkv, wo, bo,
                          single_buffer_weights=False, **kwargs)


# ----------------------------------------------------------------------------
# Module wrapper (parameter setup + packing hoisted out of the kernel)
# ----------------------------------------------------------------------------
class ModernHopfieldLayerPallas:
    """JAX/Pallas port of the PyTorch ModernHopfieldLayer forward pass."""

    def __init__(self, hidden_size=256, num_heads=4, dropout_rate=0.1,
                 beta=1.0, normalize=True, update_steps=1, seed=0,
                 mxu_dtype=jnp.float32):
        assert hidden_size % num_heads == 0
        self.hidden_size = hidden_size
        self.num_heads = num_heads
        self.head_dim = hidden_size // num_heads
        self.beta = float(beta)
        self.normalize = normalize
        self.update_steps = update_steps
        self.dropout_rate = dropout_rate       # inference: identity
        self.ln_eps = 1e-5
        self.mxu_dtype = mxu_dtype

        H = hidden_size
        root = jax.random.PRNGKey(seed)
        kq, kk, kv, ko = jax.random.split(root, 4)

        def init_linear(key, fan_in, fan_out):
            # PyTorch-Linear-like uniform(-1/sqrt(in), 1/sqrt(in)), deterministic.
            kw, kb = jax.random.split(key)
            bound = 1.0 / math.sqrt(fan_in)
            w = jax.random.uniform(kw, (fan_in, fan_out), jnp.float32, -bound, bound)
            b = jax.random.uniform(kb, (fan_out,), jnp.float32, -bound, bound)
            return w, b

        # Full-precision master weights (also used by the pure-JAX reference).
        self.wq, self.bq = init_linear(kq, H, H)
        self.wk, self.bk = init_linear(kk, H, H)
        self.wv, self.bv = init_linear(kv, H, H)
        self.wo, self.bo = init_linear(ko, H, H)
        self.ln_gamma = jnp.ones((H,), jnp.float32)
        self.ln_beta = jnp.zeros((H,), jnp.float32)

        # --- batch-invariant packing, hoisted out of the kernel -------------
        # One wide (H, 3H) QKV weight (lane-dense last dim), biases as (1, 3H).
        self.wqkv = jnp.concatenate([self.wq, self.wk, self.wv], axis=1).astype(mxu_dtype)
        self.bqkv = jnp.concatenate([self.bq, self.bk, self.bv]).reshape(1, 3 * H)
        self.wo_packed = self.wo.astype(mxu_dtype)           # (H, H)
        self.bo_2d = self.bo.reshape(1, H)
        self.ln_g_2d = self.ln_gamma.reshape(1, H)
        self.ln_b_2d = self.ln_beta.reshape(1, H)

    def forward(self, hidden_states):
        return hopfield_forward_pallas(
            hidden_states, self.ln_g_2d, self.ln_b_2d,
            self.wqkv, self.bqkv, self.wo_packed, self.bo_2d,
            num_heads=self.num_heads, beta=self.beta,
            update_steps=self.update_steps, normalize=self.normalize,
            ln_eps=self.ln_eps, mxu_dtype=self.mxu_dtype)


# ----------------------------------------------------------------------------
# Pure-JAX reference (independent formulation, full f32 weights)
# ----------------------------------------------------------------------------
def reference_forward(h, layer):
    mu = jnp.mean(h, axis=-1, keepdims=True)
    var = jnp.mean((h - mu) ** 2, axis=-1, keepdims=True)
    hn = (h - mu) / jnp.sqrt(var + layer.ln_eps) * layer.ln_gamma + layer.ln_beta
    q = hn @ layer.wq + layer.bq
    k = hn @ layer.wk + layer.bk
    v = hn @ layer.wv + layer.bv
    B, S, H = h.shape
    nH, hd = layer.num_heads, layer.head_dim
    q = q.reshape(B, S, nH, hd)
    k = k.reshape(B, S, nH, hd)
    v = v.reshape(B, S, nH, hd)
    if layer.normalize:
        q = q / jnp.maximum(jnp.linalg.norm(q, axis=-1, keepdims=True), 1e-12)
        k = k / jnp.maximum(jnp.linalg.norm(k, axis=-1, keepdims=True), 1e-12)
    state = q
    for _ in range(layer.update_steps):
        sim = jnp.einsum('bqhd,bkhd->bqhk', state, k)
        attn = jax.nn.softmax(layer.beta * sim, axis=-1)
        state = jnp.einsum('bqhk,bkhd->bqhd', attn, v)
    o = state.reshape(B, S, H)
    o = o @ layer.wo + layer.bo
    return h + o


if __name__ == "__main__":
    B, S, H, NH = 2, 8, 32, 4
    x = jax.random.normal(jax.random.PRNGKey(0), (B, S, H), jnp.float32)

    # (config, atol, rtol): f32 configs verified tightly; the bf16-MXU config
    # exercises the low-precision path with a correspondingly looser tolerance.
    configs = [
        (dict(beta=1.0, normalize=True, update_steps=1, seed=0,
              mxu_dtype=jnp.float32), 1e-4, 1e-4),
        (dict(beta=0.5, normalize=False, update_steps=2, seed=1,
              mxu_dtype=jnp.float32), 1e-4, 1e-4),
        (dict(beta=1.0, normalize=True, update_steps=1, seed=2,
              mxu_dtype=jnp.bfloat16), 5e-2, 5e-2),
    ]
    for cfg, atol, rtol in configs:
        layer = ModernHopfieldLayerPallas(hidden_size=H, num_heads=NH,
                                          dropout_rate=0.1, **cfg)
        out = jax.block_until_ready(layer.forward(x))
        ref = reference_forward(x, layer)
        assert out.shape == (B, S, H)
        err = float(jnp.max(jnp.abs(out - ref)))
        assert jnp.allclose(out, ref, atol=atol, rtol=rtol), \
            f"mismatch for config {cfg}: max abs err {err}"

    print("KERNEL_OK")
</pallas_src>

<mosaic_0001>
module attributes {stable_mosaic.version = 11 : i64} {
  func.func @_hopfield_kernel(%arg0: i32, %arg1: memref<1x8x32xf32, #tpu.memory_space<vmem>>, %arg2: memref<1x32xf32, #tpu.memory_space<vmem>>, %arg3: memref<1x32xf32, #tpu.memory_space<vmem>>, %arg4: memref<32x96xf32, #tpu.memory_space<vmem>>, %arg5: memref<1x96xf32, #tpu.memory_space<vmem>>, %arg6: memref<32x32xf32, #tpu.memory_space<vmem>>, %arg7: memref<1x32xf32, #tpu.memory_space<vmem>>, %arg8: memref<1x8x32xf32, #tpu.memory_space<vmem>>) attributes {dimension_semantics = [#tpu.dimension_semantics<parallel>], iteration_bounds = array<i64: 2>, scalar_prefetch = 0 : i64, scratch_operands = 0 : i64, tpu.core_type = #tpu.core_type<tc>, window_params = [{transform_indices = @transform_0, window_bounds = array<i64: 1, 8, 32>}, {pipeline_mode = #tpu.pipeline_mode<synchronous>, transform_indices = @transform_1, window_bounds = array<i64: 1, 32>}, {pipeline_mode = #tpu.pipeline_mode<synchronous>, transform_indices = @transform_2, window_bounds = array<i64: 1, 32>}, {pipeline_mode = #tpu.pipeline_mode<synchronous>, transform_indices = @transform_3, window_bounds = array<i64: 32, 96>}, {pipeline_mode = #tpu.pipeline_mode<synchronous>, transform_indices = @transform_4, window_bounds = array<i64: 1, 96>}, {pipeline_mode = #tpu.pipeline_mode<synchronous>, transform_indices = @transform_5, window_bounds = array<i64: 32, 32>}, {pipeline_mode = #tpu.pipeline_mode<synchronous>, transform_indices = @transform_6, window_bounds = array<i64: 1, 32>}, {transform_indices = @transform_7, window_bounds = array<i64: 1, 8, 32>}]} {
    %c0 = arith.constant 0 : index
    %c0_0 = arith.constant 0 : index
    %c0_1 = arith.constant 0 : index
    %0 = vector.load %arg1[%c0, %c0_0, %c0_1] : memref<1x8x32xf32, #tpu.memory_space<vmem>>, vector<1x8x32xf32>
    %1 = vector.shape_cast %0 : vector<1x8x32xf32> to vector<8x32xf32>
    %cst = arith.constant dense<0.000000e+00> : vector<8xf32>
    %2 = vector.multi_reduction <add>, %1, %cst [1] : vector<8x32xf32> to vector<8xf32>
    %3 = vector.shape_cast %2 : vector<8xf32> to vector<8x1xf32>
    %cst_2 = arith.constant 3.200000e+01 : f32
    %4 = vector.broadcast %cst_2 : f32 to vector<8x1xf32>
    %5 = arith.divf %3, %4 : vector<8x1xf32>
    %6 = vector.broadcast %5 : vector<8x1xf32> to vector<8x32xf32>
    %7 = arith.subf %1, %6 : vector<8x32xf32>
    %8 = arith.mulf %7, %7 : vector<8x32xf32>
    %cst_3 = arith.constant dense<0.000000e+00> : vector<8xf32>
    %9 = vector.multi_reduction <add>, %8, %cst_3 [1] : vector<8x32xf32> to vector<8xf32>
    %10 = vector.shape_cast %9 : vector<8xf32> to vector<8x1xf32>
    %cst_4 = arith.constant 3.200000e+01 : f32
    %11 = vector.broadcast %cst_4 : f32 to vector<8x1xf32>
    %12 = arith.divf %10, %11 : vector<8x1xf32>
    %cst_5 = arith.constant 9.99999974E-6 : f32
    %13 = vector.broadcast %cst_5 : f32 to vector<8x1xf32>
    %14 = arith.addf %12, %13 : vector<8x1xf32>
    %15 = math.rsqrt %14 : vector<8x1xf32>
    %16 = vector.broadcast %15 : vector<8x1xf32> to vector<8x32xf32>
    %17 = arith.mulf %7, %16 : vector<8x32xf32>
    %c0_6 = arith.constant 0 : index
    %c0_7 = arith.constant 0 : index
    %18 = vector.load %arg2[%c0_6, %c0_7] : memref<1x32xf32, #tpu.memory_space<vmem>>, vector<1x32xf32>
    %19 = vector.broadcast %18 : vector<1x32xf32> to vector<8x32xf32>
    %20 = arith.mulf %17, %19 : vector<8x32xf32>
    %c0_8 = arith.constant 0 : index
    %c0_9 = arith.constant 0 : index
    %21 = vector.load %arg3[%c0_8, %c0_9] : memref<1x32xf32, #tpu.memory_space<vmem>>, vector<1x32xf32>
    %22 = vector.broadcast %21 : vector<1x32xf32> to vector<8x32xf32>
    %23 = arith.addf %20, %22 : vector<8x32xf32>
    %c0_10 = arith.constant 0 : index
    %c0_11 = arith.constant 0 : index
    %24 = vector.load %arg4[%c0_10, %c0_11] : memref<32x96xf32, #tpu.memory_space<vmem>>, vector<32x96xf32>
    %cst_12 = arith.constant dense<0.000000e+00> : vector<8x96xf32>
    %25 = tpu.matmul %23, %24, %cst_12 {dimension_numbers = #tpu.dot_dimension_numbers<[1], [0], [0], [1], [0, 0, 1, 1], [], []>} : vector<8x32xf32>, vector<32x96xf32>, vector<8x96xf32> -> vector<8x96xf32>
    %c0_13 = arith.constant 0 : index
    %c0_14 = arith.constant 0 : index
    %26 = vector.load %arg5[%c0_13, %c0_14] : memref<1x96xf32, #tpu.memory_space<vmem>>, vector<1x96xf32>
    %27 = vector.broadcast %26 : vector<1x96xf32> to vector<8x96xf32>
    %28 = arith.addf %25, %27 : vector<8x96xf32>
    %29 = vector.extract_strided_slice %28 {offsets = [0, 0], sizes = [8, 8], strides = [1, 1]} : vector<8x96xf32> to vector<8x8xf32>
    %30 = vector.extract_strided_slice %28 {offsets = [0, 32], sizes = [8, 8], strides = [1, 1]} : vector<8x96xf32> to vector<8x8xf32>
    %31 = vector.extract_strided_slice %28 {offsets = [0, 64], sizes = [8, 8], strides = [1, 1]} : vector<8x96xf32> to vector<8x8xf32>
    %32 = arith.mulf %29, %29 : vector<8x8xf32>
    %cst_15 = arith.constant dense<0.000000e+00> : vector<8xf32>
    %33 = vector.multi_reduction <add>, %32, %cst_15 [1] : vector<8x8xf32> to vector<8xf32>
    %34 = vector.shape_cast %33 : vector<8xf32> to vector<8x1xf32>
    %cst_16 = arith.constant 1.000000e-24 : f32
    %35 = vector.broadcast %cst_16 : f32 to vector<8x1xf32>
    %36 = arith.maximumf %34, %35 : vector<8x1xf32>
    %37 = math.rsqrt %36 : vector<8x1xf32>
    %38 = vector.broadcast %37 : vector<8x1xf32> to vector<8x8xf32>
    %39 = arith.mulf %29, %38 : vector<8x8xf32>
    %40 = arith.mulf %30, %30 : vector<8x8xf32>
    %cst_17 = arith.constant dense<0.000000e+00> : vector<8xf32>
    %41 = vector.multi_reduction <add>, %40, %cst_17 [1] : vector<8x8xf32> to vector<8xf32>
    %42 = vector.shape_cast %41 : vector<8xf32> to vector<8x1xf32>
    %cst_18 = arith.constant 1.000000e-24 : f32
    %43 = vector.broadcast %cst_18 : f32 to vector<8x1xf32>
    %44 = arith.maximumf %42, %43 : vector<8x1xf32>
    %45 = math.rsqrt %44 : vector<8x1xf32>
    %46 = vector.broadcast %45 : vector<8x1xf32> to vector<8x8xf32>
    %47 = arith.mulf %30, %46 : vector<8x8xf32>
    %cst_19 = arith.constant 1.000000e+00 : f32
    %48 = vector.broadcast %cst_19 : f32 to vector<8x8xf32>
    %49 = arith.mulf %47, %48 : vector<8x8xf32>
    %50 = tpu.transpose %49, [1, 0] : vector<8x8xf32> -> vector<8x8xf32>
    %cst_20 = arith.constant dense<0.000000e+00> : vector<8x8xf32>
    %51 = tpu.matmul %39, %50, %cst_20 {dimension_numbers = #tpu.dot_dimension_numbers<[1], [0], [0], [1], [0, 0, 1, 1], [], []>} : vector<8x8xf32>, vector<8x8xf32>, vector<8x8xf32> -> vector<8x8xf32>
    %cst_21 = arith.constant dense<0xFF800000> : vector<8xf32>
    %52 = vector.multi_reduction <maximumf>, %51, %cst_21 [1] : vector<8x8xf32> to vector<8xf32>
    %53 = vector.shape_cast %52 : vector<8xf32> to vector<8x1xf32>
    %54 = vector.broadcast %53 : vector<8x1xf32> to vector<8x8xf32>
    %55 = arith.subf %51, %54 : vector<8x8xf32>
    %56 = math.exp %55 : vector<8x8xf32>
    %cst_22 = arith.constant dense<0.000000e+00> : vector<8xf32>
    %57 = vector.multi_reduction <add>, %56, %cst_22 [1] : vector<8x8xf32> to vector<8xf32>
    %58 = vector.shape_cast %57 : vector<8xf32> to vector<8x1xf32>
    %59 = tpu.reciprocal %58 : vector<8x1xf32> -> vector<8x1xf32>
    %60 = vector.broadcast %59 : vector<8x1xf32> to vector<8x8xf32>
    %61 = arith.mulf %56, %60 : vector<8x8xf32>
    %cst_23 = arith.constant dense<0.000000e+00> : vector<8x8xf32>
    %62 = tpu.matmul %61, %31, %cst_23 {dimension_numbers = #tpu.dot_dimension_numbers<[1], [0], [0], [1], [0, 0, 1, 1], [], []>} : vector<8x8xf32>, vector<8x8xf32>, vector<8x8xf32> -> vector<8x8xf32>
    %63 = vector.extract_strided_slice %28 {offsets = [0, 8], sizes = [8, 8], strides = [1, 1]} : vector<8x96xf32> to vector<8x8xf32>
    %64 = vector.extract_strided_slice %28 {offsets = [0, 40], sizes = [8, 8], strides = [1, 1]} : vector<8x96xf32> to vector<8x8xf32>
    %65 = vector.extract_strided_slice %28 {offsets = [0, 72], sizes = [8, 8], strides = [1, 1]} : vector<8x96xf32> to vector<8x8xf32>
    %66 = arith.mulf %63, %63 : vector<8x8xf32>
    %cst_24 = arith.constant dense<0.000000e+00> : vector<8xf32>
    %67 = vector.multi_reduction <add>, %66, %cst_24 [1] : vector<8x8xf32> to vector<8xf32>
    %68 = vector.shape_cast %67 : vector<8xf32> to vector<8x1xf32>
    %cst_25 = arith.constant 1.000000e-24 : f32
    %69 = vector.broadcast %cst_25 : f32 to vector<8x1xf32>
    %70 = arith.maximumf %68, %69 : vector<8x1xf32>
    %71 = math.rsqrt %70 : vector<8x1xf32>
    %72 = vector.broadcast %71 : vector<8x1xf32> to vector<8x8xf32>
    %73 = arith.mulf %63, %72 : vector<8x8xf32>
    %74 = arith.mulf %64, %64 : vector<8x8xf32>
    %cst_26 = arith.constant dense<0.000000e+00> : vector<8xf32>
    %75 = vector.multi_reduction <add>, %74, %cst_26 [1] : vector<8x8xf32> to vector<8xf32>
    %76 = vector.shape_cast %75 : vector<8xf32> to vector<8x1xf32>
    %cst_27 = arith.constant 1.000000e-24 : f32
    %77 = vector.broadcast %cst_27 : f32 to vector<8x1xf32>
    %78 = arith.maximumf %76, %77 : vector<8x1xf32>
    %79 = math.rsqrt %78 : vector<8x1xf32>
    %80 = vector.broadcast %79 : vector<8x1xf32> to vector<8x8xf32>
    %81 = arith.mulf %64, %80 : vector<8x8xf32>
    %cst_28 = arith.constant 1.000000e+00 : f32
    %82 = vector.broadcast %cst_28 : f32 to vector<8x8xf32>
    %83 = arith.mulf %81, %82 : vector<8x8xf32>
    %84 = tpu.transpose %83, [1, 0] : vector<8x8xf32> -> vector<8x8xf32>
    %cst_29 = arith.constant dense<0.000000e+00> : vector<8x8xf32>
    %85 = tpu.matmul %73, %84, %cst_29 {dimension_numbers = #tpu.dot_dimension_numbers<[1], [0], [0], [1], [0, 0, 1, 1], [], []>} : vector<8x8xf32>, vector<8x8xf32>, vector<8x8xf32> -> vector<8x8xf32>
    %cst_30 = arith.constant dense<0xFF800000> : vector<8xf32>
    %86 = vector.multi_reduction <maximumf>, %85, %cst_30 [1] : vector<8x8xf32> to vector<8xf32>
    %87 = vector.shape_cast %86 : vector<8xf32> to vector<8x1xf32>
    %88 = vector.broadcast %87 : vector<8x1xf32> to vector<8x8xf32>
    %89 = arith.subf %85, %88 : vector<8x8xf32>
    %90 = math.exp %89 : vector<8x8xf32>
    %cst_31 = arith.constant dense<0.000000e+00> : vector<8xf32>
    %91 = vector.multi_reduction <add>, %90, %cst_31 [1] : vector<8x8xf32> to vector<8xf32>
    %92 = vector.shape_cast %91 : vector<8xf32> to vector<8x1xf32>
    %93 = tpu.reciprocal %92 : vector<8x1xf32> -> vector<8x1xf32>
    %94 = vector.broadcast %93 : vector<8x1xf32> to vector<8x8xf32>
    %95 = arith.mulf %90, %94 : vector<8x8xf32>
    %cst_32 = arith.constant dense<0.000000e+00> : vector<8x8xf32>
    %96 = tpu.matmul %95, %65, %cst_32 {dimension_numbers = #tpu.dot_dimension_numbers<[1], [0], [0], [1], [0, 0, 1, 1], [], []>} : vector<8x8xf32>, vector<8x8xf32>, vector<8x8xf32> -> vector<8x8xf32>
    %97 = vector.extract_strided_slice %28 {offsets = [0, 16], sizes = [8, 8], strides = [1, 1]} : vector<8x96xf32> to vector<8x8xf32>
    %98 = vector.extract_strided_slice %28 {offsets = [0, 48], sizes = [8, 8], strides = [1, 1]} : vector<8x96xf32> to vector<8x8xf32>
    %99 = vector.extract_strided_slice %28 {offsets = [0, 80], sizes = [8, 8], strides = [1, 1]} : vector<8x96xf32> to vector<8x8xf32>
    %100 = arith.mulf %97, %97 : vector<8x8xf32>
    %cst_33 = arith.constant dense<0.000000e+00> : vector<8xf32>
    %101 = vector.multi_reduction <add>, %100, %cst_33 [1] : vector<8x8xf32> to vector<8xf32>
    %102 = vector.shape_cast %101 : vector<8xf32> to vector<8x1xf32>
    %cst_34 = arith.constant 1.000000e-24 : f32
    %103 = vector.broadcast %cst_34 : f32 to vector<8x1xf32>
    %104 = arith.maximumf %102, %103 : vector<8x1xf32>
    %105 = math.rsqrt %104 : vector<8x1xf32>
    %106 = vector.broadcast %105 : vector<8x1xf32> to vector<8x8xf32>
    %107 = arith.mulf %97, %106 : vector<8x8xf32>
    %108 = arith.mulf %98, %98 : vector<8x8xf32>
    %cst_35 = arith.constant dense<0.000000e+00> : vector<8xf32>
    %109 = vector.multi_reduction <add>, %108, %cst_35 [1] : vector<8x8xf32> to vector<8xf32>
    %110 = vector.shape_cast %109 : vector<8xf32> to vector<8x1xf32>
    %cst_36 = arith.constant 1.000000e-24 : f32
    %111 = vector.broadcast %cst_36 : f32 to vector<8x1xf32>
    %112 = arith.maximumf %110, %111 : vector<8x1xf32>
    %113 = math.rsqrt %112 : vector<8x1xf32>
    %114 = vector.broadcast %113 : vector<8x1xf32> to vector<8x8xf32>
    %115 = arith.mulf %98, %114 : vector<8x8xf32>
    %cst_37 = arith.constant 1.000000e+00 : f32
    %116 = vector.broadcast %cst_37 : f32 to vector<8x8xf32>
    %117 = arith.mulf %115, %116 : vector<8x8xf32>
    %118 = tpu.transpose %117, [1, 0] : vector<8x8xf32> -> vector<8x8xf32>
    %cst_38 = arith.constant dense<0.000000e+00> : vector<8x8xf32>
    %119 = tpu.matmul %107, %118, %cst_38 {dimension_numbers = #tpu.dot_dimension_numbers<[1], [0], [0], [1], [0, 0, 1, 1], [], []>} : vector<8x8xf32>, vector<8x8xf32>, vector<8x8xf32> -> vector<8x8xf32>
    %cst_39 = arith.constant dense<0xFF800000> : vector<8xf32>
    %120 = vector.multi_reduction <maximumf>, %119, %cst_39 [1] : vector<8x8xf32> to vector<8xf32>
    %121 = vector.shape_cast %120 : vector<8xf32> to vector<8x1xf32>
    %122 = vector.broadcast %121 : vector<8x1xf32> to vector<8x8xf32>
    %123 = arith.subf %119, %122 : vector<8x8xf32>
    %124 = math.exp %123 : vector<8x8xf32>
    %cst_40 = arith.constant dense<0.000000e+00> : vector<8xf32>
    %125 = vector.multi_reduction <add>, %124, %cst_40 [1] : vector<8x8xf32> to vector<8xf32>
    %126 = vector.shape_cast %125 : vector<8xf32> to vector<8x1xf32>
    %127 = tpu.reciprocal %126 : vector<8x1xf32> -> vector<8x1xf32>
    %128 = vector.broadcast %127 : vector<8x1xf32> to vector<8x8xf32>
    %129 = arith.mulf %124, %128 : vector<8x8xf32>
    %cst_41 = arith.constant dense<0.000000e+00> : vector<8x8xf32>
    %130 = tpu.matmul %129, %99, %cst_41 {dimension_numbers = #tpu.dot_dimension_numbers<[1], [0], [0], [1], [0, 0, 1, 1], [], []>} : vector<8x8xf32>, vector<8x8xf32>, vector<8x8xf32> -> vector<8x8xf32>
    %131 = vector.extract_strided_slice %28 {offsets = [0, 24], sizes = [8, 8], strides = [1, 1]} : vector<8x96xf32> to vector<8x8xf32>
    %132 = vector.extract_strided_slice %28 {offsets = [0, 56], sizes = [8, 8], strides = [1, 1]} : vector<8x96xf32> to vector<8x8xf32>
    %133 = vector.extract_strided_slice %28 {offsets = [0, 88], sizes = [8, 8], strides = [1, 1]} : vector<8x96xf32> to vector<8x8xf32>
    %134 = arith.mulf %131, %131 : vector<8x8xf32>
    %cst_42 = arith.constant dense<0.000000e+00> : vector<8xf32>
    %135 = vector.multi_reduction <add>, %134, %cst_42 [1] : vector<8x8xf32> to vector<8xf32>
    %136 = vector.shape_cast %135 : vector<8xf32> to vector<8x1xf32>
    %cst_43 = arith.constant 1.000000e-24 : f32
    %137 = vector.broadcast %cst_43 : f32 to vector<8x1xf32>
    %138 = arith.maximumf %136, %137 : vector<8x1xf32>
    %139 = math.rsqrt %138 : vector<8x1xf32>
    %140 = vector.broadcast %139 : vector<8x1xf32> to vector<8x8xf32>
    %141 = arith.mulf %131, %140 : vector<8x8xf32>
    %142 = arith.mulf %132, %132 : vector<8x8xf32>
    %cst_44 = arith.constant dense<0.000000e+00> : vector<8xf32>
    %143 = vector.multi_reduction <add>, %142, %cst_44 [1] : vector<8x8xf32> to vector<8xf32>
    %144 = vector.shape_cast %143 : vector<8xf32> to vector<8x1xf32>
    %cst_45 = arith.constant 1.000000e-24 : f32
    %145 = vector.broadcast %cst_45 : f32 to vector<8x1xf32>
    %146 = arith.maximumf %144, %145 : vector<8x1xf32>
    %147 = math.rsqrt %146 : vector<8x1xf32>
    %148 = vector.broadcast %147 : vector<8x1xf32> to vector<8x8xf32>
    %149 = arith.mulf %132, %148 : vector<8x8xf32>
    %cst_46 = arith.constant 1.000000e+00 : f32
    %150 = vector.broadcast %cst_46 : f32 to vector<8x8xf32>
    %151 = arith.mulf %149, %150 : vector<8x8xf32>
    %152 = tpu.transpose %151, [1, 0] : vector<8x8xf32> -> vector<8x8xf32>
    %cst_47 = arith.constant dense<0.000000e+00> : vector<8x8xf32>
    %153 = tpu.matmul %141, %152, %cst_47 {dimension_numbers = #tpu.dot_dimension_numbers<[1], [0], [0], [1], [0, 0, 1, 1], [], []>} : vector<8x8xf32>, vector<8x8xf32>, vector<8x8xf32> -> vector<8x8xf32>
    %cst_48 = arith.constant dense<0xFF800000> : vector<8xf32>
    %154 = vector.multi_reduction <maximumf>, %153, %cst_48 [1] : vector<8x8xf32> to vector<8xf32>
    %155 = vector.shape_cast %154 : vector<8xf32> to vector<8x1xf32>
    %156 = vector.broadcast %155 : vector<8x1xf32> to vector<8x8xf32>
    %157 = arith.subf %153, %156 : vector<8x8xf32>
    %158 = math.exp %157 : vector<8x8xf32>
    %cst_49 = arith.constant dense<0.000000e+00> : vector<8xf32>
    %159 = vector.multi_reduction <add>, %158, %cst_49 [1] : vector<8x8xf32> to vector<8xf32>
    %160 = vector.shape_cast %159 : vector<8xf32> to vector<8x1xf32>
    %161 = tpu.reciprocal %160 : vector<8x1xf32> -> vector<8x1xf32>
    %162 = vector.broadcast %161 : vector<8x1xf32> to vector<8x8xf32>
    %163 = arith.mulf %158, %162 : vector<8x8xf32>
    %cst_50 = arith.constant dense<0.000000e+00> : vector<8x8xf32>
    %164 = tpu.matmul %163, %133, %cst_50 {dimension_numbers = #tpu.dot_dimension_numbers<[1], [0], [0], [1], [0, 0, 1, 1], [], []>} : vector<8x8xf32>, vector<8x8xf32>, vector<8x8xf32> -> vector<8x8xf32>
    %165 = tpu.concatenate %62, %96, %130, %164 in 1 : vector<8x8xf32>, vector<8x8xf32>, vector<8x8xf32>, vector<8x8xf32> -> vector<8x32xf32>
    %c0_51 = arith.constant 0 : index
    %c0_52 = arith.constant 0 : index
    %166 = vector.load %arg6[%c0_51, %c0_52] : memref<32x32xf32, #tpu.memory_space<vmem>>, vector<32x32xf32>
    %cst_53 = arith.constant dense<0.000000e+00> : vector<8x32xf32>
    %167 = tpu.matmul %165, %166, %cst_53 {dimension_numbers = #tpu.dot_dimension_numbers<[1], [0], [0], [1], [0, 0, 1, 1], [], []>} : vector<8x32xf32>, vector<32x32xf32>, vector<8x32xf32> -> vector<8x32xf32>
    %168 = arith.addf %1, %167 : vector<8x32xf32>
    %c0_54 = arith.constant 0 : index
    %c0_55 = arith.constant 0 : index
    %169 = vector.load %arg7[%c0_54, %c0_55] : memref<1x32xf32, #tpu.memory_space<vmem>>, vector<1x32xf32>
    %170 = vector.broadcast %169 : vector<1x32xf32> to vector<8x32xf32>
    %171 = arith.addf %168, %170 : vector<8x32xf32>
    %c0_56 = arith.constant 0 : index
    %c0_57 = arith.constant 0 : index
    %c0_58 = arith.constant 0 : index
    %172 = vector.load %arg8[%c0_56, %c0_57, %c0_58] : memref<1x8x32xf32, #tpu.memory_space<vmem>>, vector<1x8x32xf32>
    %173 = vector.shape_cast %172 : vector<1x8x32xf32> to vector<8x32xf32>
    %174 = vector.shape_cast %171 : vector<8x32xf32> to vector<1x8x32xf32>
    tpu.vector_store %arg8[%c0_56, %c0_57, %c0_58], %174 {strides = array<i32>} : memref<1x8x32xf32, #tpu.memory_space<vmem>>, vector<1x8x32xf32>,
    return
  }
  func.func @transform_0(%arg0: i32) -> (i32, i32, i32) {
    %c0_i32 = arith.constant 0 : i32
    %c0_i32_0 = arith.constant 0 : i32
    %c0_i32_1 = arith.constant 0 : i32
    return %arg0, %c0_i32, %c0_i32_0 : i32, i32, i32
  }
  func.func @transform_1(%arg0: i32) -> (i32, i32) {
    %c0_i32 = arith.constant 0 : i32
    %c0_i32_0 = arith.constant 0 : i32
    %c0_i32_1 = arith.constant 0 : i32
    return %c0_i32, %c0_i32_0 : i32, i32
  }
  func.func @transform_2(%arg0: i32) -> (i32, i32) {
    %c0_i32 = arith.constant 0 : i32
    %c0_i32_0 = arith.constant 0 : i32
    %c0_i32_1 = arith.constant 0 : i32
    return %c0_i32, %c0_i32_0 : i32, i32
  }
  func.func @transform_3(%arg0: i32) -> (i32, i32) {
    %c0_i32 = arith.constant 0 : i32
    %c0_i32_0 = arith.constant 0 : i32
    %c0_i32_1 = arith.constant 0 : i32
    return %c0_i32, %c0_i32_0 : i32, i32
  }
  func.func @transform_4(%arg0: i32) -> (i32, i32) {
    %c0_i32 = arith.constant 0 : i32
    %c0_i32_0 = arith.constant 0 : i32
    %c0_i32_1 = arith.constant 0 : i32
    return %c0_i32, %c0_i32_0 : i32, i32
  }
  func.func @transform_5(%arg0: i32) -> (i32, i32) {
    %c0_i32 = arith.constant 0 : i32
    %c0_i32_0 = arith.constant 0 : i32
    %c0_i32_1 = arith.constant 0 : i32
    return %c0_i32, %c0_i32_0 : i32, i32
  }
  func.func @transform_6(%arg0: i32) -> (i32, i32) {
    %c0_i32 = arith.constant 0 : i32
    %c0_i32_0 = arith.constant 0 : i32
    %c0_i32_1 = arith.constant 0 : i32
    return %c0_i32, %c0_i32_0 : i32, i32
  }
  func.func @transform_7(%arg0: i32) -> (i32, i32, i32) {
    %c0_i32 = arith.constant 0 : i32
    %c0_i32_0 = arith.constant 0 : i32
    %c0_i32_1 = arith.constant 0 : i32
    return %arg0, %c0_i32, %c0_i32_0 : i32, i32, i32
  }
}

module attributes {stable_mosaic.version = 11 : i64} {
  func.func @_hopfield_kernel(%arg0: i32, %arg1: memref<1x8x32xf32, #tpu.memory_space<vmem>>, %arg2: memref<1x32xf32, #tpu.memory_space<vmem>>, %arg3: memref<1x32xf32, #tpu.memory_space<vmem>>, %arg4: memref<32x96xf32, #tpu.memory_space<vmem>>, %arg5: memref<1x96xf32, #tpu.memory_space<vmem>>, %arg6: memref<32x32xf32, #tpu.memory_space<vmem>>, %arg7: memref<1x32xf32, #tpu.memory_space<vmem>>, %arg8: memref<1x8x32xf32, #tpu.memory_space<vmem>>) attributes {dimension_semantics = [#tpu.dimension_semantics<parallel>], iteration_bounds = array<i64: 2>, scalar_prefetch = 0 : i64, scratch_operands = 0 : i64, tpu.core_type = #tpu.core_type<tc>, window_params = [{transform_indices = @transform_0, window_bounds = array<i64: 1, 8, 32>}, {pipeline_mode = #tpu.pipeline_mode<synchronous>, transform_indices = @transform_1, window_bounds = array<i64: 1, 32>}, {pipeline_mode = #tpu.pipeline_mode<synchronous>, transform_indices = @transform_2, window_bounds = array<i64: 1, 32>}, {pipeline_mode = #tpu.pipeline_mode<synchronous>, transform_indices = @transform_3, window_bounds = array<i64: 32, 96>}, {pipeline_mode = #tpu.pipeline_mode<synchronous>, transform_indices = @transform_4, window_bounds = array<i64: 1, 96>}, {pipeline_mode = #tpu.pipeline_mode<synchronous>, transform_indices = @transform_5, window_bounds = array<i64: 32, 32>}, {pipeline_mode = #tpu.pipeline_mode<synchronous>, transform_indices = @transform_6, window_bounds = array<i64: 1, 32>}, {transform_indices = @transform_7, window_bounds = array<i64: 1, 8, 32>}]} {
    %c0 = arith.constant 0 : index
    %c0_0 = arith.constant 0 : index
    %c0_1 = arith.constant 0 : index
    %0 = vector.load %arg1[%c0, %c0_0, %c0_1] : memref<1x8x32xf32, #tpu.memory_space<vmem>>, vector<1x8x32xf32>
    %1 = vector.shape_cast %0 : vector<1x8x32xf32> to vector<8x32xf32>
    %cst = arith.constant dense<0.000000e+00> : vector<8xf32>
    %2 = vector.multi_reduction <add>, %1, %cst [1] : vector<8x32xf32> to vector<8xf32>
    %3 = vector.shape_cast %2 : vector<8xf32> to vector<8x1xf32>
    %cst_2 = arith.constant 3.200000e+01 : f32
    %4 = vector.broadcast %cst_2 : f32 to vector<8x1xf32>
    %5 = arith.divf %3, %4 : vector<8x1xf32>
    %6 = vector.broadcast %5 : vector<8x1xf32> to vector<8x32xf32>
    %7 = arith.subf %1, %6 : vector<8x32xf32>
    %8 = arith.mulf %7, %7 : vector<8x32xf32>
    %cst_3 = arith.constant dense<0.000000e+00> : vector<8xf32>
    %9 = vector.multi_reduction <add>, %8, %cst_3 [1] : vector<8x32xf32> to vector<8xf32>
    %10 = vector.shape_cast %9 : vector<8xf32> to vector<8x1xf32>
    %cst_4 = arith.constant 3.200000e+01 : f32
    %11 = vector.broadcast %cst_4 : f32 to vector<8x1xf32>
    %12 = arith.divf %10, %11 : vector<8x1xf32>
    %cst_5 = arith.constant 9.99999974E-6 : f32
    %13 = vector.broadcast %cst_5 : f32 to vector<8x1xf32>
    %14 = arith.addf %12, %13 : vector<8x1xf32>
    %15 = math.rsqrt %14 : vector<8x1xf32>
    %16 = vector.broadcast %15 : vector<8x1xf32> to vector<8x32xf32>
    %17 = arith.mulf %7, %16 : vector<8x32xf32>
    %c0_6 = arith.constant 0 : index
    %c0_7 = arith.constant 0 : index
    %18 = vector.load %arg2[%c0_6, %c0_7] : memref<1x32xf32, #tpu.memory_space<vmem>>, vector<1x32xf32>
    %19 = vector.broadcast %18 : vector<1x32xf32> to vector<8x32xf32>
    %20 = arith.mulf %17, %19 : vector<8x32xf32>
    %c0_8 = arith.constant 0 : index
    %c0_9 = arith.constant 0 : index
    %21 = vector.load %arg3[%c0_8, %c0_9] : memref<1x32xf32, #tpu.memory_space<vmem>>, vector<1x32xf32>
    %22 = vector.broadcast %21 : vector<1x32xf32> to vector<8x32xf32>
    %23 = arith.addf %20, %22 : vector<8x32xf32>
    %c0_10 = arith.constant 0 : index
    %c0_11 = arith.constant 0 : index
    %24 = vector.load %arg4[%c0_10, %c0_11] : memref<32x96xf32, #tpu.memory_space<vmem>>, vector<32x96xf32>
    %cst_12 = arith.constant dense<0.000000e+00> : vector<8x96xf32>
    %25 = tpu.matmul %23, %24, %cst_12 {dimension_numbers = #tpu.dot_dimension_numbers<[1], [0], [0], [1], [0, 0, 1, 1], [], []>} : vector<8x32xf32>, vector<32x96xf32>, vector<8x96xf32> -> vector<8x96xf32>
    %c0_13 = arith.constant 0 : index
    %c0_14 = arith.constant 0 : index
    %26 = vector.load %arg5[%c0_13, %c0_14] : memref<1x96xf32, #tpu.memory_space<vmem>>, vector<1x96xf32>
    %27 = vector.broadcast %26 : vector<1x96xf32> to vector<8x96xf32>
    %28 = arith.addf %25, %27 : vector<8x96xf32>
    %29 = vector.extract_strided_slice %28 {offsets = [0, 0], sizes = [8, 8], strides = [1, 1]} : vector<8x96xf32> to vector<8x8xf32>
    %30 = vector.extract_strided_slice %28 {offsets = [0, 32], sizes = [8, 8], strides = [1, 1]} : vector<8x96xf32> to vector<8x8xf32>
    %31 = vector.extract_strided_slice %28 {offsets = [0, 64], sizes = [8, 8], strides = [1, 1]} : vector<8x96xf32> to vector<8x8xf32>
    %32 = arith.mulf %29, %29 : vector<8x8xf32>
    %cst_15 = arith.constant dense<0.000000e+00> : vector<8xf32>
    %33 = vector.multi_reduction <add>, %32, %cst_15 [1] : vector<8x8xf32> to vector<8xf32>
    %34 = vector.shape_cast %33 : vector<8xf32> to vector<8x1xf32>
    %cst_16 = arith.constant 1.000000e-24 : f32
    %35 = vector.broadcast %cst_16 : f32 to vector<8x1xf32>
    %36 = arith.maximumf %34, %35 : vector<8x1xf32>
    %37 = math.rsqrt %36 : vector<8x1xf32>
    %38 = vector.broadcast %37 : vector<8x1xf32> to vector<8x8xf32>
    %39 = arith.mulf %29, %38 : vector<8x8xf32>
    %40 = arith.mulf %30, %30 : vector<8x8xf32>
    %cst_17 = arith.constant dense<0.000000e+00> : vector<8xf32>
    %41 = vector.multi_reduction <add>, %40, %cst_17 [1] : vector<8x8xf32> to vector<8xf32>
    %42 = vector.shape_cast %41 : vector<8xf32> to vector<8x1xf32>
    %cst_18 = arith.constant 1.000000e-24 : f32
    %43 = vector.broadcast %cst_18 : f32 to vector<8x1xf32>
    %44 = arith.maximumf %42, %43 : vector<8x1xf32>
    %45 = math.rsqrt %44 : vector<8x1xf32>
    %46 = vector.broadcast %45 : vector<8x1xf32> to vector<8x8xf32>
    %47 = arith.mulf %30, %46 : vector<8x8xf32>
    %cst_19 = arith.constant 1.000000e+00 : f32
    %48 = vector.broadcast %cst_19 : f32 to vector<8x8xf32>
    %49 = arith.mulf %47, %48 : vector<8x8xf32>
    %50 = tpu.transpose %49, [1, 0] : vector<8x8xf32> -> vector<8x8xf32>
    %cst_20 = arith.constant dense<0.000000e+00> : vector<8x8xf32>
    %51 = tpu.matmul %39, %50, %cst_20 {dimension_numbers = #tpu.dot_dimension_numbers<[1], [0], [0], [1], [0, 0, 1, 1], [], []>} : vector<8x8xf32>, vector<8x8xf32>, vector<8x8xf32> -> vector<8x8xf32>
    %cst_21 = arith.constant dense<0xFF800000> : vector<8xf32>
    %52 = vector.multi_reduction <maximumf>, %51, %cst_21 [1] : vector<8x8xf32> to vector<8xf32>
    %53 = vector.shape_cast %52 : vector<8xf32> to vector<8x1xf32>
    %54 = vector.broadcast %53 : vector<8x1xf32> to vector<8x8xf32>
    %55 = arith.subf %51, %54 : vector<8x8xf32>
    %56 = math.exp %55 : vector<8x8xf32>
    %cst_22 = arith.constant dense<0.000000e+00> : vector<8xf32>
    %57 = vector.multi_reduction <add>, %56, %cst_22 [1] : vector<8x8xf32> to vector<8xf32>
    %58 = vector.shape_cast %57 : vector<8xf32> to vector<8x1xf32>
    %59 = tpu.reciprocal %58 : vector<8x1xf32> -> vector<8x1xf32>
    %60 = vector.broadcast %59 : vector<8x1xf32> to vector<8x8xf32>
    %61 = arith.mulf %56, %60 : vector<8x8xf32>
    %cst_23 = arith.constant dense<0.000000e+00> : vector<8x8xf32>
    %62 = tpu.matmul %61, %31, %cst_23 {dimension_numbers = #tpu.dot_dimension_numbers<[1], [0], [0], [1], [0, 0, 1, 1], [], []>} : vector<8x8xf32>, vector<8x8xf32>, vector<8x8xf32> -> vector<8x8xf32>
    %63 = vector.extract_strided_slice %28 {offsets = [0, 8], sizes = [8, 8], strides = [1, 1]} : vector<8x96xf32> to vector<8x8xf32>
    %64 = vector.extract_strided_slice %28 {offsets = [0, 40], sizes = [8, 8], strides = [1, 1]} : vector<8x96xf32> to vector<8x8xf32>
    %65 = vector.extract_strided_slice %28 {offsets = [0, 72], sizes = [8, 8], strides = [1, 1]} : vector<8x96xf32> to vector<8x8xf32>
    %66 = arith.mulf %63, %63 : vector<8x8xf32>
    %cst_24 = arith.constant dense<0.000000e+00> : vector<8xf32>
    %67 = vector.multi_reduction <add>, %66, %cst_24 [1] : vector<8x8xf32> to vector<8xf32>
    %68 = vector.shape_cast %67 : vector<8xf32> to vector<8x1xf32>
    %cst_25 = arith.constant 1.000000e-24 : f32
    %69 = vector.broadcast %cst_25 : f32 to vector<8x1xf32>
    %70 = arith.maximumf %68, %69 : vector<8x1xf32>
    %71 = math.rsqrt %70 : vector<8x1xf32>
    %72 = vector.broadcast %71 : vector<8x1xf32> to vector<8x8xf32>
    %73 = arith.mulf %63, %72 : vector<8x8xf32>
    %74 = arith.mulf %64, %64 : vector<8x8xf32>
    %cst_26 = arith.constant dense<0.000000e+00> : vector<8xf32>
    %75 = vector.multi_reduction <add>, %74, %cst_26 [1] : vector<8x8xf32> to vector<8xf32>
    %76 = vector.shape_cast %75 : vector<8xf32> to vector<8x1xf32>
    %cst_27 = arith.constant 1.000000e-24 : f32
    %77 = vector.broadcast %cst_27 : f32 to vector<8x1xf32>
    %78 = arith.maximumf %76, %77 : vector<8x1xf32>
    %79 = math.rsqrt %78 : vector<8x1xf32>
    %80 = vector.broadcast %79 : vector<8x1xf32> to vector<8x8xf32>
    %81 = arith.mulf %64, %80 : vector<8x8xf32>
    %cst_28 = arith.constant 1.000000e+00 : f32
    %82 = vector.broadcast %cst_28 : f32 to vector<8x8xf32>
    %83 = arith.mulf %81, %82 : vector<8x8xf32>
    %84 = tpu.transpose %83, [1, 0] : vector<8x8xf32> -> vector<8x8xf32>
    %cst_29 = arith.constant dense<0.000000e+00> : vector<8x8xf32>
    %85 = tpu.matmul %73, %84, %cst_29 {dimension_numbers = #tpu.dot_dimension_numbers<[1], [0], [0], [1], [0, 0, 1, 1], [], []>} : vector<8x8xf32>, vector<8x8xf32>, vector<8x8xf32> -> vector<8x8xf32>
    %cst_30 = arith.constant dense<0xFF800000> : vector<8xf32>
    %86 = vector.multi_reduction <maximumf>, %85, %cst_30 [1] : vector<8x8xf32> to vector<8xf32>
    %87 = vector.shape_cast %86 : vector<8xf32> to vector<8x1xf32>
    %88 = vector.broadcast %87 : vector<8x1xf32> to vector<8x8xf32>
    %89 = arith.subf %85, %88 : vector<8x8xf32>
    %90 = math.exp %89 : vector<8x8xf32>
    %cst_31 = arith.constant dense<0.000000e+00> : vector<8xf32>
    %91 = vector.multi_reduction <add>, %90, %cst_31 [1] : vector<8x8xf32> to vector<8xf32>
    %92 = vector.shape_cast %91 : vector<8xf32> to vector<8x1xf32>
    %93 = tpu.reciprocal %92 : vector<8x1xf32> -> vector<8x1xf32>
    %94 = vector.broadcast %93 : vector<8x1xf32> to vector<8x8xf32>
    %95 = arith.mulf %90, %94 : vector<8x8xf32>
    %cst_32 = arith.constant dense<0.000000e+00> : vector<8x8xf32>
    %96 = tpu.matmul %95, %65, %cst_32 {dimension_numbers = #tpu.dot_dimension_numbers<[1], [0], [0], [1], [0, 0, 1, 1], [], []>} : vector<8x8xf32>, vector<8x8xf32>, vector<8x8xf32> -> vector<8x8xf32>
    %97 = vector.extract_strided_slice %28 {offsets = [0, 16], sizes = [8, 8], strides = [1, 1]} : vector<8x96xf32> to vector<8x8xf32>
    %98 = vector.extract_strided_slice %28 {offsets = [0, 48], sizes = [8, 8], strides = [1, 1]} : vector<8x96xf32> to vector<8x8xf32>
    %99 = vector.extract_strided_slice %28 {offsets = [0, 80], sizes = [8, 8], strides = [1, 1]} : vector<8x96xf32> to vector<8x8xf32>
    %100 = arith.mulf %97, %97 : vector<8x8xf32>
    %cst_33 = arith.constant dense<0.000000e+00> : vector<8xf32>
    %101 = vector.multi_reduction <add>, %100, %cst_33 [1] : vector<8x8xf32> to vector<8xf32>
    %102 = vector.shape_cast %101 : vector<8xf32> to vector<8x1xf32>
    %cst_34 = arith.constant 1.000000e-24 : f32
    %103 = vector.broadcast %cst_34 : f32 to vector<8x1xf32>
    %104 = arith.maximumf %102, %103 : vector<8x1xf32>
    %105 = math.rsqrt %104 : vector<8x1xf32>
    %106 = vector.broadcast %105 : vector<8x1xf32> to vector<8x8xf32>
    %107 = arith.mulf %97, %106 : vector<8x8xf32>
    %108 = arith.mulf %98, %98 : vector<8x8xf32>
    %cst_35 = arith.constant dense<0.000000e+00> : vector<8xf32>
    %109 = vector.multi_reduction <add>, %108, %cst_35 [1] : vector<8x8xf32> to vector<8xf32>
    %110 = vector.shape_cast %109 : vector<8xf32> to vector<8x1xf32>
    %cst_36 = arith.constant 1.000000e-24 : f32
    %111 = vector.broadcast %cst_36 : f32 to vector<8x1xf32>
    %112 = arith.maximumf %110, %111 : vector<8x1xf32>
    %113 = math.rsqrt %112 : vector<8x1xf32>
    %114 = vector.broadcast %113 : vector<8x1xf32> to vector<8x8xf32>
    %115 = arith.mulf %98, %114 : vector<8x8xf32>
    %cst_37 = arith.constant 1.000000e+00 : f32
    %116 = vector.broadcast %cst_37 : f32 to vector<8x8xf32>
    %117 = arith.mulf %115, %116 : vector<8x8xf32>
    %118 = tpu.transpose %117, [1, 0] : vector<8x8xf32> -> vector<8x8xf32>
    %cst_38 = arith.constant dense<0.000000e+00> : vector<8x8xf32>
    %119 = tpu.matmul %107, %118, %cst_38 {dimension_numbers = #tpu.dot_dimension_numbers<[1], [0], [0], [1], [0, 0, 1, 1], [], []>} : vector<8x8xf32>, vector<8x8xf32>, vector<8x8xf32> -> vector<8x8xf32>
    %cst_39 = arith.constant dense<0xFF800000> : vector<8xf32>
    %120 = vector.multi_reduction <maximumf>, %119, %cst_39 [1] : vector<8x8xf32> to vector<8xf32>
    %121 = vector.shape_cast %120 : vector<8xf32> to vector<8x1xf32>
    %122 = vector.broadcast %121 : vector<8x1xf32> to vector<8x8xf32>
    %123 = arith.subf %119, %122 : vector<8x8xf32>
    %124 = math.exp %123 : vector<8x8xf32>
    %cst_40 = arith.constant dense<0.000000e+00> : vector<8xf32>
    %125 = vector.multi_reduction <add>, %124, %cst_40 [1] : vector<8x8xf32> to vector<8xf32>
    %126 = vector.shape_cast %125 : vector<8xf32> to vector<8x1xf32>
    %127 = tpu.reciprocal %126 : vector<8x1xf32> -> vector<8x1xf32>
    %128 = vector.broadcast %127 : vector<8x1xf32> to vector<8x8xf32>
    %129 = arith.mulf %124, %128 : vector<8x8xf32>
    %cst_41 = arith.constant dense<0.000000e+00> : vector<8x8xf32>
    %130 = tpu.matmul %129, %99, %cst_41 {dimension_numbers = #tpu.dot_dimension_numbers<[1], [0], [0], [1], [0, 0, 1, 1], [], []>} : vector<8x8xf32>, vector<8x8xf32>, vector<8x8xf32> -> vector<8x8xf32>
    %131 = vector.extract_strided_slice %28 {offsets = [0, 24], sizes = [8, 8], strides = [1, 1]} : vector<8x96xf32> to vector<8x8xf32>
    %132 = vector.extract_strided_slice %28 {offsets = [0, 56], sizes = [8, 8], strides = [1, 1]} : vector<8x96xf32> to vector<8x8xf32>
    %133 = vector.extract_strided_slice %28 {offsets = [0, 88], sizes = [8, 8], strides = [1, 1]} : vector<8x96xf32> to vector<8x8xf32>
    %134 = arith.mulf %131, %131 : vector<8x8xf32>
    %cst_42 = arith.constant dense<0.000000e+00> : vector<8xf32>
    %135 = vector.multi_reduction <add>, %134, %cst_42 [1] : vector<8x8xf32> to vector<8xf32>
    %136 = vector.shape_cast %135 : vector<8xf32> to vector<8x1xf32>
    %cst_43 = arith.constant 1.000000e-24 : f32
    %137 = vector.broadcast %cst_43 : f32 to vector<8x1xf32>
    %138 = arith.maximumf %136, %137 : vector<8x1xf32>
    %139 = math.rsqrt %138 : vector<8x1xf32>
    %140 = vector.broadcast %139 : vector<8x1xf32> to vector<8x8xf32>
    %141 = arith.mulf %131, %140 : vector<8x8xf32>
    %142 = arith.mulf %132, %132 : vector<8x8xf32>
    %cst_44 = arith.constant dense<0.000000e+00> : vector<8xf32>
    %143 = vector.multi_reduction <add>, %142, %cst_44 [1] : vector<8x8xf32> to vector<8xf32>
    %144 = vector.shape_cast %143 : vector<8xf32> to vector<8x1xf32>
    %cst_45 = arith.constant 1.000000e-24 : f32
    %145 = vector.broadcast %cst_45 : f32 to vector<8x1xf32>
    %146 = arith.maximumf %144, %145 : vector<8x1xf32>
    %147 = math.rsqrt %146 : vector<8x1xf32>
    %148 = vector.broadcast %147 : vector<8x1xf32> to vector<8x8xf32>
    %149 = arith.mulf %132, %148 : vector<8x8xf32>
    %cst_46 = arith.constant 1.000000e+00 : f32
    %150 = vector.broadcast %cst_46 : f32 to vector<8x8xf32>
    %151 = arith.mulf %149, %150 : vector<8x8xf32>
    %152 = tpu.transpose %151, [1, 0] : vector<8x8xf32> -> vector<8x8xf32>
    %cst_47 = arith.constant dense<0.000000e+00> : vector<8x8xf32>
    %153 = tpu.matmul %141, %152, %cst_47 {dimension_numbers = #tpu.dot_dimension_numbers<[1], [0], [0], [1], [0, 0, 1, 1], [], []>} : vector<8x8xf32>, vector<8x8xf32>, vector<8x8xf32> -> vector<8x8xf32>
    %cst_48 = arith.constant dense<0xFF800000> : vector<8xf32>
    %154 = vector.multi_reduction <maximumf>, %153, %cst_48 [1] : vector<8x8xf32> to vector<8xf32>
    %155 = vector.shape_cast %154 : vector<8xf32> to vector<8x1xf32>
    %156 = vector.broadcast %155 : vector<8x1xf32> to vector<8x8xf32>
    %157 = arith.subf %153, %156 : vector<8x8xf32>
    %158 = math.exp %157 : vector<8x8xf32>
    %cst_49 = arith.constant dense<0.000000e+00> : vector<8xf32>
    %159 = vector.multi_reduction <add>, %158, %cst_49 [1] : vector<8x8xf32> to vector<8xf32>
    %160 = vector.shape_cast %159 : vector<8xf32> to vector<8x1xf32>
    %161 = tpu.reciprocal %160 : vector<8x1xf32> -> vector<8x1xf32>
    %162 = vector.broadcast %161 : vector<8x1xf32> to vector<8x8xf32>
    %163 = arith.mulf %158, %162 : vector<8x8xf32>
    %cst_50 = arith.constant dense<0.000000e+00> : vector<8x8xf32>
    %164 = tpu.matmul %163, %133, %cst_50 {dimension_numbers = #tpu.dot_dimension_numbers<[1], [0], [0], [1], [0, 0, 1, 1], [], []>} : vector<8x8xf32>, vector<8x8xf32>, vector<8x8xf32> -> vector<8x8xf32>
    %165 = tpu.concatenate %62, %96, %130, %164 in 1 : vector<8x8xf32>, vector<8x8xf32>, vector<8x8xf32>, vector<8x8xf32> -> vector<8x32xf32>
    %c0_51 = arith.constant 0 : index
    %c0_52 = arith.constant 0 : index
    %166 = vector.load %arg6[%c0_51, %c0_52] : memref<32x32xf32, #tpu.memory_space<vmem>>, vector<32x32xf32>
    %cst_53 = arith.constant dense<0.000000e+00> : vector<8x32xf32>
    %167 = tpu.matmul %165, %166, %cst_53 {dimension_numbers = #tpu.dot_dimension_numbers<[1], [0], [0], [1], [0, 0, 1, 1], [], []>} : vector<8x32xf32>, vector<32x32xf32>, vector<8x32xf32> -> vector<8x32xf32>
    %168 = arith.addf %1, %167 : vector<8x32xf32>
    %c0_54 = arith.constant 0 : index
    %c0_55 = arith.constant 0 : index
    %169 = vector.load %arg7[%c0_54, %c0_55] : memref<1x32xf32, #tpu.memory_space<vmem>>, vector<1x32xf32>
    %170 = vector.broadcast %169 : vector<1x32xf32> to vector<8x32xf32>
    %171 = arith.addf %168, %170 : vector<8x32xf32>
    %c0_56 = arith.constant 0 : index
    %c0_57 = arith.constant 0 : index
    %c0_58 = arith.constant 0 : index
    %172 = vector.load %arg8[%c0_56, %c0_57, %c0_58] : memref<1x8x32xf32, #tpu.memory_space<vmem>>, vector<1x8x32xf32>
    %173 = vector.shape_cast %172 : vector<1x8x32xf32> to vector<8x32xf32>
    %174 = vector.shape_cast %171 : vector<8x32xf32> to vector<1x8x32xf32>
    tpu.vector_store %arg8[%c0_56, %c0_57, %c0_58], %174 {strides = array<i32>} : memref<1x8x32xf32, #tpu.memory_space<vmem>>, vector<1x8x32xf32>,
    return
  }
  func.func @transform_0(%arg0: i32) -> (i32, i32, i32) {
    %c0_i32 = arith.constant 0 : i32
    %c0_i32_0 = arith.constant 0 : i32
    %c0_i32_1 = arith.constant 0 : i32
    return %arg0, %c0_i32, %c0_i32_0 : i32, i32, i32
  }
  func.func @transform_1(%arg0: i32) -> (i32, i32) {
    %c0_i32 = arith.constant 0 : i32
    %c0_i32_0 = arith.constant 0 : i32
    %c0_i32_1 = arith.constant 0 : i32
    return %c0_i32, %c0_i32_0 : i32, i32
  }
  func.func @transform_2(%arg0: i32) -> (i32, i32) {
    %c0_i32 = arith.constant 0 : i32
    %c0_i32_0 = arith.constant 0 : i32
    %c0_i32_1 = arith.constant 0 : i32
    return %c0_i32, %c0_i32_0 : i32, i32
  }
  func.func @transform_3(%arg0: i32) -> (i32, i32) {
    %c0_i32 = arith.constant 0 : i32
    %c0_i32_0 = arith.constant 0 : i32
    %c0_i32_1 = arith.constant 0 : i32
    return %c0_i32, %c0_i32_0 : i32, i32
  }
  func.func @transform_4(%arg0: i32) -> (i32, i32) {
    %c0_i32 = arith.constant 0 : i32
    %c0_i32_0 = arith.constant 0 : i32
    %c0_i32_1 = arith.constant 0 : i32
    return %c0_i32, %c0_i32_0 : i32, i32
  }
  func.func @transform_5(%arg0: i32) -> (i32, i32) {
    %c0_i32 = arith.constant 0 : i32
    %c0_i32_0 = arith.constant 0 : i32
    %c0_i32_1 = arith.constant 0 : i32
    return %c0_i32, %c0_i32_0 : i32, i32
  }
  func.func @transform_6(%arg0: i32) -> (i32, i32) {
    %c0_i32 = arith.constant 0 : i32
    %c0_i32_0 = arith.constant 0 : i32
    %c0_i32_1 = arith.constant 0 : i32
    return %c0_i32, %c0_i32_0 : i32, i32
  }
  func.func @transform_7(%arg0: i32) -> (i32, i32, i32) {
    %c0_i32 = arith.constant 0 : i32
    %c0_i32_0 = arith.constant 0 : i32
    %c0_i32_1 = arith.constant 0 : i32
    return %arg0, %c0_i32, %c0_i32_0 : i32, i32, i32
  }
}

</mosaic_0001>

<bundles_post_ra>
// kernel: tpu_custom_call.1
= control target key start
LH: loop header
LB: loop body
LE: loop exit
PB: predicated region body
PF: predicated region fallthrough
CT: control target
= control target key end

     0   :  { %s1719_s0 = inlined_call_operand.hbm [shape: f32[2,8,32], index: 0, kind: input, shape index: {}]   ;;  %s1720_s1 = inlined_call_operand.hbm [shape: f32[1,32], index: 1, kind: input, shape index: {}]   ;;  %s1721_s2 = inlined_call_operand.vmem [shape: f32[1,32], index: 2, kind: input, shape index: {}]   ;;  %s1722_s3 = inlined_call_operand.hbm [shape: f32[32,96], index: 3, kind: input, shape index: {}]   ;;  %s1723_s4 = inlined_call_operand.vmem [shape: f32[1,96], index: 4, kind: input, shape index: {}]   ;;  %s1724_s5 = inlined_call_operand.hbm [shape: f32[32,32], index: 5, kind: input, shape index: {}]   ;;  %s1725_s6 = inlined_call_operand.vmem [shape: f32[1,32], index: 6, kind: input, shape index: {}]   ;;  %s1726_s7 = inlined_call_operand.hbm [shape: f32[2,8,32], index: 7, kind: output, shape index: {}]  }
   0x1   :  { %1727 = sst [smem:[#allocation15_spill]] %s1720_s1 }
   0x2   :  { %12 = vsyncpa [#allocation3], 0 }
   0x3   :  { %14 = vsyncpa [#allocation3 + $0x1], 0 }
   0x4   :  { %15 = vsyncpa [#allocation6], 0 }
   0x5   :  { %16 = vsyncpa [#allocation9], 0 }
   0x6   :  { %17 = vsyncpa [#allocation4], 0 }
   0x7   :  { %19 = vsyncpa [#allocation4 + $0x1], 0  ;;  %s1467_s24 = smov 0   ;;  %s1469_s25 = smov 0  }
   0x8   :  { %s1471_s26 = smov 0   ;;  %s1473_s27 = smov 0  }
   0x9 LB: > { %s1488_s28 = sadd.s32 4294967295, %s1405_s27   ;;  %s1045_s29 = sadd.s32 4294967294, %s1405_s27   ;;  %s1405_s27 = sphi %s1473_s27, %s1739_s27   ;;  %s1401_s26 = sphi %s1471_s26, %s1738_s26   ;;  %s1397_s25 = sphi %s1469_s25, %s1737_s25   ;;  %s1393_s24 = sphi %s1467_s24, %s1736_s24  }
   0xa   : > { %p45_p0 = scmp.ne.s32.totalorder %s1397_s25, %s1393_s24  ;;  %p46_p1 = scmp.eq.s32.totalorder %s1488_s28, 0 }
   0xb   : > { %p195_p2 = scmp.eq.s32.totalorder %s1488_s28, 1  ;;  %p201_p3 = scmp.eq.s32.totalorder %s1045_s29, 1 }
   0xc   : > { %p1497_p4 = por %p46_p1, %p45_p0  ;;  %p1046_p5 = scmp.ge.s32.totalorder %s1405_s27, 1 }
   0xd   : > { %p1502_p6 = por %p201_p3, %p45_p0  ;;  %p208_p7 = scmp.lt.s32.totalorder %s1405_s27, 3 }
   0xe   : > { %s1730_s1 = sld [smem:[#allocation15_spill]]  ;;  %s1407_s13 = smov [#allocation5]  }
   0xf   : > { %p1510_p8 = pnand %p1046_p5, %p208_p7  ;;  %s222_s14 = sshll.u32 %s1407_s13, 4  ;;  %s223_s14 = int_to_ptr.vmem [resolvable:$true] %s222_s14 }
  0x10   : > { %s234_s17 = sshll.u32 %s1722_s3, 4  ;;  %s1408_s19 = smov [#allocation7]   ;;  %s235_s17 = int_to_ptr.hbm [resolvable:$true] %s234_s17 }
  0x11   : > { %p1093_p10 = pneg %p1510_p8  ;;  %s236_s20 = sshll.u32 %s1408_s19, 4  ;;  %s237_s20 = int_to_ptr.vmem [resolvable:$true] %s236_s20 }
  0x12   : > { %s1409_s21 = smov 128   ;;  %s1410_s22 = smov 8  }
  0x13   : > { %p1522_p11 = pnand %p1093_p10, %p46_p1  ;;  %s251_s9 = sshll.u32 %s1724_s5, 4  ;;  %s252_s9 = int_to_ptr.hbm [resolvable:$true] %s251_s9 }
  0x14   : > { %s220_s11 = sshll.u32 %s1730_s1, 4  ;;  %s1411_s10 = smov [#allocation8]   ;;  %s221_s11 = int_to_ptr.hbm [resolvable:$true] %s220_s11 }
  0x15   : > { %1096 = dma.hbm_to_vmem [thread:$0]  (!%p1522_p11), %s221_s11, 16, %s223_s14, [#allocation6]  }
  0x16   : > { %1099 = dma.hbm_to_vmem [thread:$0]  (!%p1522_p11), %s235_s17, 512, %s237_s20, [#allocation6], %s1409_s21, %s1409_s21, %s1410_s22  }
  0x17   : > { %s253_s13 = sshll.u32 %s1411_s10, 4  ;;  %s1536_s11 = sadd.s32 1, %s1405_s27   ;;  %s254_s13 = int_to_ptr.vmem [resolvable:$true] %s253_s13 }
  0x18   : > { %1102 = dma.hbm_to_vmem [thread:$0]  (!%p1522_p11), %s252_s9, 512, %s254_s13, [#allocation9], %s1409_s21, %s1409_s21, %s1410_s22  }
  0x19   : > { %s29_s14 = ssub.s32 %s1405_s27, %s1536_s11  ;;  %s32_s15 = sadd.s32 1, %s1401_s26 }
  0x1a   : > { %p30_p12 = scmp.eq.s32.totalorder %s29_s14, 0  ;;  %p39_p13 = scmp.ne.s32.totalorder %s1401_s26, %s1397_s25 }
  0x1b   : > { %p40_p0 = scmp.eq.s32.totalorder %s1405_s27, 0  ;;  %p1114_p5 = scmp.lt.s32.totalorder %s1405_s27, 2 }
  0x1c   : > { %s1545_s16 = scalar_select %p30_p12, %s1401_s26, %s32_s15  }
  0x1d   : > { %p1549_p3 = por %p195_p2, %p39_p13  ;;  %s270_s19 = sand.u32 1, %s1401_s26  }
  0x1e   : > { %s1052_s20 = sshll.u32 %s1405_s27, 3  ;;  %p41_p7 = por %p40_p0, %p39_p13 }
  0x1f   : > { %s1051_s18 = sshll.u32 %s270_s19, 3  ;;  %s278_s23 = scalar_lea.hbm %s1719_s0, %s1052_s20 }
  0x20   : > { %s280_s29 = sshll.u32 %s278_s23, 4  ;;  %s274_s9 = scalar_lea.vmem [#allocation2], %s1051_s18  ;;  %s281_s29 = int_to_ptr.hbm [resolvable:$true] %s280_s29 }
  0x21   : > { %s282_s10 = sshll.u32 %s274_s9, 4  ;;  %p1559_p10 = pnand %p1114_p5, %p41_p7  ;;  %s283_s10 = int_to_ptr.vmem [resolvable:$true] %s282_s10 }
  0x22   : > { %s271_s14 = scalar_lea.sflag [#allocation3], %s270_s19  ;;  %s1301_s15 = sshra.s32 %s281_s29, 4  ;;  %s1302_s15 = int_to_ptr.hbm [resolvable:$true] %s1301_s15 }
  0x23   : > { %s1303_s1 = scalar_lea.hbm %s1302_s15, 8  ;;  %p1305_p11 = pneg %p1559_p10 }
  0x24   : > { %p1304_p2 = scmp.ne.s32.totalorder %s1302_s15, %s1303_s1  ;;  %s1308_s18 = scalar_lea.hbm %s1719_s0, 16 }
  0x25   : > { %p1309_p0 = scmp.lt.s32.totalorder %s1302_s15, %s1719_s0  ;;  %p1310_p5 = scmp.lt.s32.totalorder %s1308_s18, %s1303_s1 }
  0x26   : > { %p1306_p12 = pnand %p1305_p11, %p1304_p2 }
  0x27   : > { %p1311_p7 = por %p1310_p5, %p1309_p0 }
  0x28   : > { %p1307_p13 = pneg %p1306_p12 }
  0x2a   : > { %p1312_p9 = pnand %p1311_p7, %p1307_p13 }
  0x2c   : > { %1315 = shalt.err (!%p1312_p9)
}
  0x2d   : > { %1106 = dma.hbm_to_vmem [thread:$0]  (!%p1559_p10), %s281_s29, 128, %s283_s10, %s271_s14  }
  0x2e   : > { %291 = sbr.rel (%p1510_p8) target bundleno = 1621 (0x655), region = 48  ;;  %s1576_s19 = sand.u32 (!%p1510_p8), 1, %s1397_s25  }
  0x2f   : > { %s1054_s9 = sshll.u32 (!%p1510_p8), %s1576_s19, 3  ;;  %s294_s20 = scalar_lea.sflag (!%p1510_p8), [#allocation3], %s1576_s19 }
  0x30   : > { %s297_s1 = scalar_lea.vmem (!%p1510_p8), [#allocation2], %s1054_s9 }
  0x33   : > { %1376 = dma.done.wait (%p1497_p4), %s294_s20, 128  }
  0x34   : > { %1378 = vsyncadd (%p1497_p4), %s294_s20, 4294967168 }
  0x35   : > { %1380 = dma.done.wait (%p46_p1), [#allocation6], 528  }
  0x36   : > { %1382 = vsyncadd (%p46_p1), [#allocation6], 4294966768 }
  0x37   : > { %1384 = dma.done.wait (%p46_p1), [#allocation9], 512  }
  0x38   : > { %1386 = vsyncadd (%p46_p1), [#allocation9], 4294966784  ;;  %vm345_vm0 = vcmask 261120   ;;  %v1594_v0 = vld [vmem:[%s297_s1] sm:$0xff]  ;;  %v1412_v2 = vmov 32.0   ;;  %v385_v17 = vld [vmem:[#allocation7] sm:$0xff] }
  0x39   : > { %v346_v1 = vsel %vm345_vm0, %v1594_v0, 0.0  ;;  %1175 = vrcp.f32 %v1412_v2  ;;  %v388_v14 = vld [vmem:[#allocation7 + $0x18] sm:$0xff]  ;;  %v387_v15 = vld [vmem:[#allocation7 + $0x10] sm:$0xff]  ;;  %v386_v16 = vld [vmem:[#allocation7 + $0x8] sm:$0xff]  ;;  %s1413_s13 = smov 72   ;;  %s1414_s14 = smov 120  }
  0x3a   : > { %347 = vadd.xlane.f32.xlu0 %v346_v1  ;;  %408 = vmatpush.msra.mxu0 %v388_v14  ;;  %v1171_v27 = vld [vmem:[#allocation5] ss:$0 sm:$0xff]  ;;  %v1172_v30 = vld [vmem:[%s1721_s2] ss:$0 sm:$0xff]  ;;  %s1415_s15 = smov 96   ;;  %s1416_s21 = smov 80  }
  0x3b   : > { %v1173_v33 = vld [vmem:[%s1723_s4] ss:$0 sm:$0xff]  ;;  %s1417_s18 = smov 88   ;;  %s1418_s22 = smov 104   ;;  %vm417_vm5 = vcmask 64512  }
  0x3c   : > { %409 = vmatpush.msra.mxu0 %v387_v15  ;;  %s1419_s23 = smov 112   ;;  %s1420_s20 = smov 56  }
  0x3d   : > { %s1421_s1 = smov 48   ;;  %s1422_s30 = smov 64  }
  0x3e   : > { %410 = vmatpush.msra.mxu0 %v386_v16  ;;  %s1423_s12 = smov 40   ;;  %s1424_s29 = smov 8  }
  0x3f   : > { %v1176_v3 = vpop.eup %1175  ;;  %s1425_s10 = smov 16  }
  0x40   : > { %v350_v4 = vmul.f32 32.0, %v1176_v3  ;;  %vm354_vm1 = vweird.f32 %v1176_v3  ;;  %411 = vmatpush.msra.mxu0 %v385_v17 }
  0x42   : > { %v351_v5 = vsub.f32 1.0, %v350_v4 }
  0x44   : > { %v352_v6 = vmul.f32 %v1176_v3, %v351_v5 }
  0x46   : > { %v353_v7 = vadd.f32 %v1176_v3, %v352_v6 }
  0x48   : > { %v355_v8 = vsel %vm354_vm1, %v1176_v3, %v353_v7 }
  0xad   : > { %v348_v9 = vpop.xlane.xlu0 %347 }
  0xae   : > { %v356_v10 = vmul.f32 %v355_v8, %v348_v9 }
  0xb0   : > { %v357_v11 = vsub.f32 %v1594_v0, %v356_v10 }
  0xb2   : > { %v358_v12 = vmul.f32 %v357_v11, %v357_v11 }
  0xb4   : > { %v359_v13 = vsel %vm345_vm0, %v358_v12, 0.0 }
  0xb5   : > { %360 = vadd.xlane.f32.xlu0 %v359_v13 }
 0x128   : > { %v361_v18 = vpop.xlane.xlu0 %360 }
 0x129   : > { %v362_v19 = vmul.f32 %v361_v18, %v355_v8 }
 0x12b   : > { %v363_v20 = vadd.f32 1e-05, %v362_v19 }
 0x12d   : > { %1177 = vrsqrt.f32 %v363_v20  ;;  %vm370_vm3 = vweird.f32 %v363_v20 }
 0x133   : > { %v1178_v21 = vpop.eup %1177 }
 0x134   : > { %v365_v22 = vmul.f32 %v1178_v21, %v363_v20  ;;  %vm371_vm2 = vweird.f32 %v1178_v21 }
 0x135   : > { %vm372_vm4 = vmor %vm370_vm3, %vm371_vm2 }
 0x136   : > { %v366_v23 = vmul.f32 %v1178_v21, %v365_v22 }
 0x138   : > { %v367_v24 = vmul.f32 0.5, %v366_v23 }
 0x13a   : > { %v368_v25 = vsub.f32 1.5, %v367_v24 }
 0x13c   : > { %v369_v26 = vmul.f32 %v1178_v21, %v368_v25 }
 0x13e   : > { %v373_v28 = vsel %vm372_vm4, %v1178_v21, %v369_v26 }
 0x13f   : > { %v374_v29 = vmul.f32 %v373_v28, %v357_v11 }
 0x141   : > { %v379_v31 = vmul.f32 %v1171_v27, %v374_v29 }
 0x143   : > { %v384_v32 = vadd.f32 %v1172_v30, %v379_v31 }
 0x145   : > { %1059 = vmatmul.msk.f32.vlgmr.msra.gmra.mxu0 %vm345_vm0, %v384_v32 }
 0x1c2   : > { %v413_v34 = vpop.f32.mrf.mxu0 }
 0x1c3   : > { %v1607_v35 = vadd.f32 %v1173_v33, %v413_v34 }
 0x1c5   : > { %v416_v36 = vmul.f32 %v1607_v35, %v1607_v35 }
 0x1c7   : > { %781 = vrot.lane.b32.xlu0 %v416_v36, %s1413_s13  ;;  %531 = vrot.lane.b32.xlu2 %v416_v36, %s1414_s14  ;;  %v418_v39 = vsel %vm417_vm5, %v416_v36, 0.0 }
 0x1c8   : > { %434 = vrot.lane.b32.xlu1 %v416_v36, %s1415_s15 }
 0x1cf   : > { %665 = vrot.lane.b32.xlu2 %v416_v36, %s1416_s21 }
 0x1d0   : > { %549 = vrot.lane.b32.xlu1 %v416_v36, %s1417_s18 }
 0x1d7   : > { %763 = vrot.lane.b32.xlu2 %v416_v36, %s1418_s22 }
 0x1d8   : > { %647 = vrot.lane.b32.xlu1 %v416_v36, %s1419_s23 }
 0x221   : > { %v532_v37 = vpop.permute.xlu2 %531 }
 0x222   : > { %v534_v38 = vsel %vm417_vm5, %v532_v37, 0.0 }
 0x223   : > { %535 = vadd.xlane.f32.xlu0 %v534_v38 }
 0x229   : > { %v666_v42 = vpop.permute.xlu2 %665 }
 0x22a   : > { %v668_v49 = vsel %vm417_vm5, %v666_v42, 0.0 }
 0x22b   : > { %419 = vadd.xlane.f32.xlu0 %v418_v39 }
 0x231   : > { %v764_v47 = vpop.permute.xlu2 %763 }
 0x232   : > { %v766_v48 = vsel %vm417_vm5, %v764_v47, 0.0 }
 0x239   : > { %v782_v43 = vpop.permute.xlu0 %781 }
 0x23a   : > { %v435_v40 = vpop.permute.xlu1 %434  ;;  %v784_v45 = vsel %vm417_vm5, %v782_v43, 0.0 }
 0x23b   : > { %v437_v41 = vsel %vm417_vm5, %v435_v40, 0.0 }
 0x23c   : > { %438 = vadd.xlane.f32.xlu1 %v437_v41 }
 0x242   : > { %v550_v44 = vpop.permute.xlu1 %549 }
 0x243   : > { %v552_v46 = vsel %vm417_vm5, %v550_v44, 0.0 }
 0x244   : > { %785 = vadd.xlane.f32.xlu1 %v784_v45  ;;  %553 = vadd.xlane.f32.xlu2 %v552_v46 }
 0x24a   : > { %v648_v50 = vpop.permute.xlu1 %647 }
 0x24b   : > { %v650_v51 = vsel %vm417_vm5, %v648_v50, 0.0 }
 0x24c   : > { %767 = vadd.xlane.f32.xlu1 %v766_v48  ;;  %669 = vadd.xlane.f32.xlu2 %v668_v49 }
 0x254   : > { %651 = vadd.xlane.f32.xlu2 %v650_v51 }
 0x296   : > { %v536_v52 = vpop.xlane.xlu0 %535 }
 0x297   : > { %v537_v53 = vmax.f32 %v536_v52, 1e-24 }
 0x299   : > { %1179 = vrsqrt.f32 %v537_v53  ;;  %vm544_vm7 = vweird.f32 %v537_v53 }
 0x29f   : > { %v1180_v54 = vpop.eup %1179 }
 0x2a0   : > { %v539_v55 = vmul.f32 %v1180_v54, %v537_v53  ;;  %vm545_vm6 = vweird.f32 %v1180_v54 }
 0x2a1   : > { %vm546_vm8 = vmor %vm544_vm7, %vm545_vm6 }
 0x2a2   : > { %v540_v56 = vmul.f32 %v1180_v54, %v539_v55 }
 0x2a4   : > { %v541_v57 = vmul.f32 0.5, %v540_v56 }
 0x2a6   : > { %v542_v58 = vsub.f32 1.5, %v541_v57 }
 0x2a8   : > { %v543_v59 = vmul.f32 %v1180_v54, %v542_v58 }
 0x2aa   : > { %v547_v60 = vsel %vm546_vm8, %v1180_v54, %v543_v59 }
 0x2ab   : > { %v548_v61 = vmul.f32 %v547_v60, %v1607_v35  ;;  %v420_v60 = vpop.xlane.xlu0 %419 }
 0x2ad   : > { %568 = vrot.lane.b32.xlu0 %v548_v61, %s1414_s14  ;;  %v421_v61 = vmax.f32 %v420_v60, 1e-24  ;;  %s1074_s14 = sshll.u32 %s1488_s28, 3  ;;  %s931_s28 = scalar_lea.sflag [#allocation4], %s1576_s19 }
 0x2af   : > { %v439_v62 = vpop.xlane.xlu1 %438 }
 0x2b0   : > { %v440_v63 = vmax.f32 %v439_v62, 1e-24 }
 0x2b2   : > { %1181 = vrsqrt.f32 %v440_v63  ;;  %vm447_vm10 = vweird.f32 %v440_v63 }
 0x2b7   : > { %v554_v1 = vpop.xlane.xlu2 %553  ;;  %v786_v2 = vpop.xlane.xlu1 %785 }
 0x2b8   : > { %v1182_v3 = vpop.eup %1181  ;;  %v555_v4 = vmax.f32 %v554_v1, 1e-24  ;;  %v787_v5 = vmax.f32 %v786_v2, 1e-24 }
 0x2b9   : > { %v442_v6 = vmul.f32 %v1182_v3, %v440_v63  ;;  %vm448_vm9 = vweird.f32 %v1182_v3 }
 0x2ba   : > { %1183 = vrsqrt.f32 %v555_v4  ;;  %vm449_vm11 = vmor %vm447_vm10, %vm448_vm9  ;;  %vm562_vm13 = vweird.f32 %v555_v4  ;;  %vm794_vm1 = vweird.f32 %v787_v5 }
 0x2bb   : > { %v443_v7 = vmul.f32 %v1182_v3, %v442_v6  ;;  %1185 = vrsqrt.f32 %v787_v5 }
 0x2bd   : > { %v444_v8 = vmul.f32 0.5, %v443_v7 }
 0x2bf   : > { %v445_v9 = vsub.f32 1.5, %v444_v8  ;;  %v670_v10 = vpop.xlane.xlu2 %669  ;;  %v768_v11 = vpop.xlane.xlu1 %767 }
 0x2c0   : > { %v1184_v12 = vpop.eup %1183  ;;  %v671_v13 = vmax.f32 %v670_v10, 1e-24  ;;  %v769_v14 = vmax.f32 %v768_v11, 1e-24 }
 0x2c1   : > { %v1186_v15 = vpop.eup %1185  ;;  %v557_v16 = vmul.f32 %v1184_v12, %v555_v4  ;;  %v446_v17 = vmul.f32 %v1182_v3, %v445_v9  ;;  %vm563_vm12 = vweird.f32 %v1184_v12 }
 0x2c2   : > { %v789_v18 = vmul.f32 %v1186_v15, %v787_v5  ;;  %1187 = vrsqrt.f32 %v671_v13  ;;  %vm795_vm14 = vweird.f32 %v1186_v15  ;;  %vm564_vm15 = vmor %vm562_vm13, %vm563_vm12  ;;  %vm678_vm4 = vweird.f32 %v671_v13 }
 0x2c3   : > { %v558_v19 = vmul.f32 %v1184_v12, %v557_v16  ;;  %1189 = vrsqrt.f32 %v769_v14  ;;  %v450_v20 = vsel %vm449_vm11, %v1182_v3, %v446_v17  ;;  %vm796_vm2 = vmor %vm794_vm1, %vm795_vm14  ;;  %vm776_vm8 = vweird.f32 %v769_v14 }
 0x2c4   : > { %v790_v21 = vmul.f32 %v1186_v15, %v789_v18  ;;  %v451_v22 = vmul.f32 %v450_v20, %v1607_v35  ;;  %vm428_vm14 = vweird.f32 %v421_v61 }
 0x2c5   : > { %v559_v23 = vmul.f32 0.5, %v558_v19 }
 0x2c6   : > { %v791_v24 = vmul.f32 0.5, %v790_v21  ;;  %453 = vrot.lane.b32.xlu2 %v451_v22, %s1415_s15 }
 0x2c7   : > { %v560_v25 = vsub.f32 1.5, %v559_v23  ;;  %v652_v26 = vpop.xlane.xlu2 %651 }
 0x2c8   : > { %v1188_v27 = vpop.eup %1187  ;;  %v792_v28 = vsub.f32 1.5, %v791_v24  ;;  %v653_v29 = vmax.f32 %v652_v26, 1e-24 }
 0x2c9   : > { %v1190_v30 = vpop.eup %1189  ;;  %v673_v31 = vmul.f32 %v1188_v27, %v671_v13  ;;  %v561_v32 = vmul.f32 %v1184_v12, %v560_v25  ;;  %vm679_vm3 = vweird.f32 %v1188_v27 }
 0x2ca   : > { %v771_v33 = vmul.f32 %v1190_v30, %v769_v14  ;;  %1191 = vrsqrt.f32 %v653_v29  ;;  %v793_v37 = vmul.f32 %v1186_v15, %v792_v28  ;;  %vm680_vm6 = vmor %vm678_vm4, %vm679_vm3  ;;  %vm777_vm7 = vweird.f32 %v1190_v30 }
 0x2cb   : > { %v674_v34 = vmul.f32 %v1188_v27, %v673_v31  ;;  %v565_v36 = vsel %vm564_vm15, %v1184_v12, %v561_v32  ;;  %vm778_vm10 = vmor %vm776_vm8, %vm777_vm7  ;;  %vm660_vm11 = vweird.f32 %v653_v29  ;;  %1193 = vrsqrt.f32 %v421_v61 }
 0x2cc   : > { %v772_v38 = vmul.f32 %v1190_v30, %v771_v33  ;;  %v566_v39 = vmul.f32 %v565_v36, %v1607_v35  ;;  %v797_v41 = vsel %vm796_vm2, %v1186_v15, %v793_v37 }
 0x2cd   : > { %v675_v40 = vmul.f32 0.5, %v674_v34  ;;  %v798_v43 = vmul.f32 %v797_v41, %v1607_v35 }
 0x2ce   : > { %v773_v42 = vmul.f32 0.5, %v772_v38  ;;  %571 = vrot.lane.b32.xlu1 %v566_v39, %s1417_s18  ;;  %s941_s18 = scalar_lea.hbm %s1726_s7, %s1074_s14 }
 0x2cf   : > { %v676_v44 = vsub.f32 1.5, %v675_v40  ;;  %803 = vrot.lane.b32.xlu0 %v798_v43, %s1413_s13  ;;  %s1426_s13 = smov 24  }
 0x2d0   : > { %v1192_v45 = vpop.eup %1191  ;;  %v774_v46 = vsub.f32 1.5, %v773_v42 }
 0x2d1   : > { %v655_v47 = vmul.f32 %v1192_v45, %v653_v29  ;;  %v677_v48 = vmul.f32 %v1188_v27, %v676_v44  ;;  %vm661_vm9 = vweird.f32 %v1192_v45  ;;  %v1194_v62 = vpop.eup %1193 }
 0x2d2   : > { %v775_v53 = vmul.f32 %v1190_v30, %v774_v46  ;;  %vm662_vm12 = vmor %vm660_vm11, %vm661_vm9  ;;  %v423_v63 = vmul.f32 %v1194_v62, %v421_v61  ;;  %vm429_vm13 = vweird.f32 %v1194_v62 }
 0x2d3   : > { %v656_v49 = vmul.f32 %v1192_v45, %v655_v47  ;;  %v681_v50 = vsel %vm680_vm6, %v1188_v27, %v677_v48  ;;  %vm430_vm15 = vmor %vm428_vm14, %vm429_vm13 }
 0x2d4   : > { %v682_v51 = vmul.f32 %v681_v50, %v1607_v35  ;;  %v779_v56 = vsel %vm778_vm10, %v1190_v30, %v775_v53  ;;  %v424_v1 = vmul.f32 %v1194_v62, %v423_v63 }
 0x2d5   : > { %v657_v52 = vmul.f32 0.5, %v656_v49  ;;  %v780_v59 = vmul.f32 %v779_v56, %v1607_v35 }
 0x2d6   : > { %687 = vrot.lane.b32.xlu2 %v682_v51, %s1416_s21  ;;  %v425_v2 = vmul.f32 0.5, %v424_v1 }
 0x2d7   : > { %v658_v54 = vsub.f32 1.5, %v657_v52 }
 0x2d8   : > { %v426_v3 = vsub.f32 1.5, %v425_v2 }
 0x2d9   : > { %v659_v55 = vmul.f32 %v1192_v45, %v658_v54 }
 0x2da   : > { %v427_v4 = vmul.f32 %v1194_v62, %v426_v3 }
 0x2db   : > { %v663_v57 = vsel %vm662_vm12, %v1192_v45, %v659_v55 }
 0x2dc   : > { %v664_v58 = vmul.f32 %v663_v57, %v1607_v35  ;;  %v431_v5 = vsel %vm430_vm15, %v1194_v62, %v427_v4 }
 0x2dd   : > { %v432_v7 = vmul.f32 %v431_v5, %v1607_v35 }
 0x2de   : > { %684 = vrot.lane.b32.xlu1 %v664_v58, %s1419_s23  ;;  %800 = vrot.lane.b32.xlu2 %v780_v59, %s1418_s22 }
 0x31f   : > { %v569_v9 = vpop.permute.xlu0 %568 }
 0x320   : > { %v454_v6 = vpop.permute.xlu2 %453 }
 0x321   : > { %1060 = vmatpush.xpose.msk.msra.mxu1 %vm417_vm5, %v454_v6 }
 0x324   : > { %1061 = vmatmul.msk.f32.vlgmr.msra.gmra.mxu1 %vm417_vm5, %v432_v7 }
 0x330   : > { %v688_v8 = vpop.permute.xlu2 %687 }
 0x331   : > { %1066 = vmatpush.xpose.msk.msrb.mxu1 %vm417_vm5, %v688_v8 }
 0x338   : > { %v801_v12 = vpop.permute.xlu2 %800 }
 0x340   : > { %v572_v10 = vpop.permute.xlu1 %571 }
 0x341   : > { %1063 = vmatpush.xpose.msk.msra.mxu3 %vm417_vm5, %v572_v10  ;;  %v804_v11 = vpop.permute.xlu0 %803 }
 0x342   : > { %1069 = vmatpush.xpose.msk.msrb.mxu0 %vm417_vm5, %v804_v11 }
 0x344   : > { %1064 = vmatmul.msk.f32.vlgmr.msra.gmra.mxu3 %vm417_vm5, %v569_v9 }
 0x345   : > { %1070 = vmatmul.msk.f32.vlgmr.msrb.gmra.mxu0 %vm417_vm5, %v801_v12 }
 0x350   : > { %v685_v13 = vpop.permute.xlu1 %684 }
 0x351   : > { %1067 = vmatmul.msk.f32.vlgmr.msrb.gmra.mxu1 %vm417_vm5, %v685_v13 }
 0x3a1   : > { %v477_v14 = vpop.f32.mrf.mxu1 }
 0x3a2   : > { %v480_v15 = vsel %vm417_vm5, %v477_v14, -inf }
 0x3a3   : > { %481 = vmax.xlane.f32.xlu0 %v480_v15 }
 0x3c2   : > { %v826_v16 = vpop.f32.mrf.mxu0 }
 0x3c3   : > { %v829_v17 = vsel %vm417_vm5, %v826_v16, -inf }
 0x3c4   : > { %830 = vmax.xlane.f32.xlu0 %v829_v17 }
 0x3c7   : > { %v594_v18 = vpop.f32.mrf.mxu3 }
 0x3c8   : > { %v597_v19 = vsel %vm417_vm5, %v594_v18, -inf }
 0x3c9   : > { %598 = vmax.xlane.f32.xlu1 %v597_v19 }
 0x3ce   : > { %v710_v20 = vpop.f32.mrf.mxu1 }
 0x3cf   : > { %v713_v21 = vsel %vm417_vm5, %v710_v20, -inf }
 0x3d0   : > { %714 = vmax.xlane.f32.xlu2 %v713_v21 }
 0x3d8   : > { %621 = vrot.lane.b32.xlu0 %v1607_v35, %s1420_s20  ;;  %s343_s20 = scalar_lea.vmem [#allocation10], %s1054_s9  ;;  %s1351_s9 = scalar_lea.hbm %s1726_s7, 16 }
 0x416   : > { %v482_v22 = vpop.xlane.xlu0 %481 }
 0x417   : > { %v483_v23 = vsub.f32 %v477_v14, %v482_v22 }
 0x419   : > { %v484_v24 = vmul.f32 1.442695, %v483_v23 }
 0x41b   : > { %1195 = vpow2.f32 %v484_v24 }
 0x421   : > { %v1196_v25 = vpop.eup %1195 }
 0x422   : > { %v486_v26 = vsel %vm417_vm5, %v1196_v25, 0.0 }
 0x423   : > { %487 = vadd.xlane.f32.xlu1 %v486_v26 }
 0x437   : > { %v831_v27 = vpop.xlane.xlu0 %830 }
 0x438   : > { %v832_v28 = vsub.f32 %v826_v16, %v831_v27 }
 0x43a   : > { %v833_v29 = vmul.f32 1.442695, %v832_v28 }
 0x43c   : > { %v599_v30 = vpop.xlane.xlu1 %598  ;;  %1197 = vpow2.f32 %v833_v29 }
 0x43d   : > { %v600_v31 = vsub.f32 %v594_v18, %v599_v30 }
 0x43f   : > { %v601_v32 = vmul.f32 1.442695, %v600_v31 }
 0x441   : > { %1199 = vpow2.f32 %v601_v32 }
 0x442   : > { %v1655_v33 = vpop.eup %1197 }
 0x443   : > { %v715_v34 = vpop.xlane.xlu2 %714  ;;  %v835_v37 = vsel %vm417_vm5, %v1655_v33, 0.0 }
 0x444   : > { %v716_v36 = vsub.f32 %v710_v20, %v715_v34  ;;  %836 = vadd.xlane.f32.xlu1 %v835_v37  ;;  %v899_v37 = vld [vmem:[#allocation8 + $0x18] sm:$0xff] }
 0x445   : > { %915 = vmatpush.msra.mxu1 %v899_v37 }
 0x446   : > { %v717_v38 = vmul.f32 1.442695, %v716_v36 }
 0x447   : > { %v1659_v39 = vpop.eup %1199 }
 0x448   : > { %1201 = vpow2.f32 %v717_v38  ;;  %v603_v40 = vsel %vm417_vm5, %v1659_v39, 0.0  ;;  %v898_v38 = vld [vmem:[#allocation8 + $0x10] sm:$0xff] }
 0x449   : > { %604 = vadd.xlane.f32.xlu2 %v603_v40  ;;  %916 = vmatpush.msra.mxu1 %v898_v38 }
 0x44a   : > { %v622_v50 = vpop.permute.xlu0 %621 }
 0x44e   : > { %v1663_v41 = vpop.eup %1201 }
 0x44f   : > { %v719_v42 = vsel %vm417_vm5, %v1663_v41, 0.0 }
 0x450   : > { %720 = vadd.xlane.f32.xlu0 %v719_v42 }
 0x45d   : > { %737 = vrot.lane.b32.xlu1 %v1607_v35, %s1421_s1  ;;  %s943_s1 = sshll.u32 %s343_s20, 4  ;;  %s944_s1 = int_to_ptr.vmem [resolvable:$true] %s943_s1 }
 0x461   : > { %505 = vrot.lane.b32.xlu2 %v1607_v35, %s1422_s30  ;;  %s945_s30 = sshll.u32 %s941_s18, 4  ;;  %s946_s30 = int_to_ptr.hbm [resolvable:$true] %s945_s30 }
 0x464   : > { %853 = vrot.lane.b32.xlu0 %v1607_v35, %s1423_s12  ;;  %s1345_s12 = sshra.s32 %s946_s30, 4  ;;  %s1346_s12 = int_to_ptr.hbm [resolvable:$true] %s1345_s12 }
 0x465   : > { %p1352_p9 = scmp.lt.s32.totalorder %s1346_s12, %s1726_s7 }
 0x496   : > { %v488_v43 = vpop.xlane.xlu1 %487 }
 0x497   : > { %1203 = vrcp.f32 %v488_v43  ;;  %v500_v51 = vand.u32 2147483648, %v488_v43  ;;  %vm494_vm2 = vweird.f32 %v488_v43  ;;  %v498_v53 = vand.u32 2147483647, %v488_v43 }
 0x499   : > { %v501_v35 = vor.u32 1.1754944e-38, %v500_v51  ;;  %vm499_vm4 = vcmp.eq.f32.partialorder %v498_v53, 8.507059e+37 }
 0x49d   : > { %v1204_v44 = vpop.eup %1203 }
 0x49e   : > { %v490_v45 = vmul.f32 %v1204_v44, %v488_v43  ;;  %vm495_vm1 = vweird.f32 %v1204_v44 }
 0x49f   : > { %vm496_vm3 = vmor %vm494_vm2, %vm495_vm1 }
 0x4a0   : > { %v491_v46 = vsub.f32 1.0, %v490_v45 }
 0x4a2   : > { %v492_v47 = vmul.f32 %v1204_v44, %v491_v46  ;;  %v1174_v46 = vld [vmem:[%s1725_s6] ss:$0 sm:$0xff] }
 0x4a4   : > { %v493_v49 = vadd.f32 %v1204_v44, %v492_v47 }
 0x4a6   : > { %v497_v54 = vsel %vm496_vm3, %v1204_v44, %v493_v49  ;;  %vm892_vm3 = vcmask 130048  }
 0x4a7   : > { %v502_v57 = vsel %vm499_vm4, %v501_v35, %v497_v54  ;;  %vm894_vm4 = vcmask 195584  }
 0x4a8   : > { %v503_v63 = vmul.f32 %v1196_v25, %v502_v57 }
 0x4b7   : > { %v837_v48 = vpop.xlane.xlu1 %836 }
 0x4b8   : > { %1205 = vrcp.f32 %v837_v48  ;;  %v849_v12 = vand.u32 2147483648, %v837_v48  ;;  %vm843_vm11 = vweird.f32 %v837_v48  ;;  %v847_v15 = vand.u32 2147483647, %v837_v48 }
 0x4ba   : > { %v850_v22 = vor.u32 1.1754944e-38, %v849_v12  ;;  %vm848_vm15 = vcmp.eq.f32.partialorder %v847_v15, 8.507059e+37 }
 0x4bc   : > { %v605_v52 = vpop.xlane.xlu2 %604 }
 0x4bd   : > { %1207 = vrcp.f32 %v605_v52  ;;  %v617_v2 = vand.u32 2147483648, %v605_v52  ;;  %v615_v5 = vand.u32 2147483647, %v605_v52  ;;  %vm611_vm7 = vweird.f32 %v605_v52 }
 0x4be   : > { %v1206_v55 = vpop.eup %1205 }
 0x4bf   : > { %v839_v56 = vmul.f32 %v1206_v55, %v837_v48  ;;  %v618_v8 = vor.u32 1.1754944e-38, %v617_v2  ;;  %vm844_vm9 = vweird.f32 %v1206_v55  ;;  %vm616_vm10 = vcmp.eq.f32.partialorder %v615_v5, 8.507059e+37 }
 0x4c0   : > { %vm845_vm12 = vmor %vm843_vm11, %vm844_vm9 }
 0x4c1   : > { %v840_v60 = vsub.f32 1.0, %v839_v56 }
 0x4c3   : > { %v1208_v58 = vpop.eup %1207  ;;  %v721_v59 = vpop.xlane.xlu0 %720  ;;  %v841_v3 = vmul.f32 %v1206_v55, %v840_v60 }
 0x4c4   : > { %v607_v61 = vmul.f32 %v1208_v58, %v605_v52  ;;  %1209 = vrcp.f32 %v721_v59  ;;  %v506_v62 = vpop.permute.xlu2 %505  ;;  %vm612_vm6 = vweird.f32 %v1208_v58  ;;  %v733_v16 = vand.u32 2147483648, %v721_v59 }
 0x4c5   : > { %526 = vmatpush.msra.mxu2 %v506_v62  ;;  %vm613_vm8 = vmor %vm611_vm7, %vm612_vm6  ;;  %v842_v10 = vadd.f32 %v1206_v55, %v841_v3  ;;  %v731_v19 = vand.u32 2147483647, %v721_v59  ;;  %vm727_vm14 = vweird.f32 %v721_v59 }
 0x4c6   : > { %v608_v1 = vsub.f32 1.0, %v607_v61  ;;  %1062 = vmatmul.msk.f32.vlgmr.msra.gmra.mxu2 %vm417_vm5, %v503_v63  ;;  %v734_v24 = vor.u32 1.1754944e-38, %v733_v16 }
 0x4c7   : > { %642 = vmatpush.msrb.mxu2 %v622_v50  ;;  %v846_v20 = vsel %vm845_vm12, %v1206_v55, %v842_v10  ;;  %vm732_vm2 = vcmp.eq.f32.partialorder %v731_v19, 8.507059e+37 }
 0x4c8   : > { %v609_v4 = vmul.f32 %v1208_v58, %v608_v1  ;;  %v851_v25 = vsel %vm848_vm15, %v850_v22, %v846_v20 }
 0x4c9   : > { %v852_v30 = vmul.f32 %v1655_v33, %v851_v25  ;;  %v897_v33 = vld [vmem:[#allocation8 + $0x8] sm:$0xff] }
 0x4ca   : > { %v1210_v6 = vpop.eup %1209  ;;  %v610_v7 = vadd.f32 %v1208_v58, %v609_v4  ;;  %917 = vmatpush.msra.mxu1 %v897_v33 }
 0x4cb   : > { %v723_v9 = vmul.f32 %v1210_v6, %v721_v59  ;;  %vm728_vm13 = vweird.f32 %v1210_v6 }
 0x4cc   : > { %v614_v11 = vsel %vm613_vm8, %v1208_v58, %v610_v7  ;;  %vm729_vm1 = vmor %vm727_vm14, %vm728_vm13 }
 0x4cd   : > { %v724_v13 = vsub.f32 1.0, %v723_v9  ;;  %v619_v14 = vsel %vm616_vm10, %v618_v8, %v614_v11 }
 0x4ce   : > { %v620_v17 = vmul.f32 %v1659_v39, %v619_v14  ;;  %v896_v39 = vld [vmem:[#allocation8] sm:$0xff] }
 0x4cf   : > { %v725_v18 = vmul.f32 %v1210_v6, %v724_v13  ;;  %v738_v21 = vpop.permute.xlu1 %737  ;;  %918 = vmatpush.msra.mxu1 %v896_v39 }
 0x4d0   : > { %1065 = vmatmul.msk.f32.vlgmr.msrb.gmra.mxu2 %vm417_vm5, %v620_v17  ;;  %758 = vmatpush.msrb.mxu3 %v738_v21 }
 0x4d1   : > { %v726_v23 = vadd.f32 %v1210_v6, %v725_v18 }
 0x4d3   : > { %v730_v26 = vsel %vm729_vm1, %v1210_v6, %v726_v23 }
 0x4d4   : > { %v735_v27 = vsel %vm732_vm2, %v734_v24, %v730_v26 }
 0x4d5   : > { %v736_v28 = vmul.f32 %v1663_v41, %v735_v27 }
 0x4d6   : > { %v854_v29 = vpop.permute.xlu0 %853 }
 0x4d7   : > { %1068 = vmatmul.msk.f32.vlgmr.msrb.gmra.mxu3 %vm417_vm5, %v736_v28  ;;  %874 = vmatpush.msra.mxu2 %v854_v29 }
 0x4d8   : > { %1071 = vmatmul.msk.f32.vlgmr.msra.gmra.mxu2 %vm417_vm5, %v852_v30 }
 0x549   : > { %v528_v31 = vpop.f32.mrf.mxu2 }
 0x553   : > { %v644_v32 = vpop.f32.mrf.mxu2 }
 0x554   : > { %880 = vrot.lane.b32.xlu2 %v644_v32, %s1424_s29  ;;  %s1347_s29 = scalar_lea.hbm %s1346_s12, 8 }
 0x555   : > { %p1348_p1 = scmp.ne.s32.totalorder %s1346_s12, %s1347_s29  ;;  %p1353_p10 = scmp.lt.s32.totalorder %s1351_s9, %s1347_s29 }
 0x557   : > { %p1349_p4 = pnand %p1348_p1, %p1549_p3  ;;  %p1354_p2 = por %p1353_p10, %p1352_p9 }
 0x559   : > { %p1350_p8 = pneg %p1349_p4 }
 0x55a   : > { %v760_v34 = vpop.f32.mrf.mxu3 }
 0x55b   : > { %884 = vrot.lane.b32.xlu1 %v760_v34, %s1425_s10  ;;  %v876_v36 = vpop.f32.mrf.mxu2  ;;  %p1355_p11 = pnand %p1354_p2, %p1350_p8 }
 0x55c   : > { %888 = vrot.lane.b32.xlu0 %v876_v36, %s1426_s13 }
 0x5ae   : > { %v881_v40 = vpop.permute.xlu2 %880 }
 0x5af   : > { %v891_v41 = vsel %vm417_vm5, %v528_v31, %v881_v40 }
 0x5cd   : > { %v885_v42 = vpop.permute.xlu1 %884 }
 0x5ce   : > { %v893_v43 = vsel %vm892_vm3, %v891_v41, %v885_v42  ;;  %v889_v44 = vpop.permute.xlu0 %888 }
 0x5cf   : > { %v895_v45 = vsel %vm894_vm4, %v893_v43, %v889_v44 }
 0x5d0   : > { %1072 = vmatmul.msk.f32.vlgmr.msra.gmra.mxu1 %vm345_vm0, %v895_v45 }
 0x64d   : > { %v920_v47 = vpop.f32.mrf.mxu1 }
 0x64e   : > { %v923_v48 = vadd.f32 %v920_v47, %v1594_v0 }
 0x650   : > { %v928_v49 = vadd.f32 %v1174_v46, %v923_v48 }
 0x652   : > { %929 = vst.msk [vmem:[%s343_s20] sm:$0xff] %vm345_vm0, %v928_v49 }
 0x653   : > { %1358 = shalt.err (!%p1355_p11)
}
 0x654   : > { %1091 = dma.vmem_to_hbm [thread:$0]  (%p1549_p3), %s944_s1, 128, %s946_s30, %s931_s28  }
 0x655 PF: > { %s957_s19 = sand.u32 1, %s1393_s24   ;;  %p1735_p12 = scmp.ge.s32.totalorder %s1405_s27, 2 }
 0x656   : > { %s958_s21 = scalar_lea.sflag [#allocation4], %s957_s19 }
 0x657   : > { %p1108_p13 = pnand %p1735_p12, %p1502_p6 }
 0x659   : > { %p1109_p0 = pneg %p1108_p13 }
 0x65b   : > { %1388 = dma.done.wait (%p1109_p0), %s958_s21, 128  }
 0x65c   : > { %1390 = vsyncadd (%p1109_p0), %s958_s21, 4294967168  ;;  %p22_p5 = scmp.ge.s32.totalorder %s1536_s11, 4   ;;  %s1736_s24 = smov %s1397_s25 }
 0x65d   : > { %s1737_s25 = smov %s1401_s26  ;;  %s1738_s26 = smov %s1545_s16 }
 0x65e   : > { %s1739_s27 = smov %s1536_s11  ;;  %24 = sbr.rel (!%p22_p5) target bundleno = 9 (0x9), region = 105 }
 0x663   :  { %964 = vsyncpa [#allocation3], 1 }
 0x664   :  { %966 = vsyncpa [#allocation3 + $0x1], 1 }
 0x665   :  { %967 = vsyncpa [#allocation6], 1 }
 0x666   :  { %968 = vsyncpa [#allocation9], 1 }
 0x667   :  { %969 = vsyncpa [#allocation4], 1 }
 0x668   :  { %971 = vsyncpa [#allocation4 + $0x1], 1 }

// kernel: tpu_custom_call.1
= control target key start
LH: loop header
LB: loop body
LE: loop exit
PB: predicated region body
PF: predicated region fallthrough
CT: control target
= control target key end

     0   :  { %s1719_s0 = inlined_call_operand.hbm [shape: f32[2,8,32], index: 0, kind: input, shape index: {}]   ;;  %s1720_s1 = inlined_call_operand.hbm [shape: f32[1,32], index: 1, kind: input, shape index: {}]   ;;  %s1721_s2 = inlined_call_operand.vmem [shape: f32[1,32], index: 2, kind: input, shape index: {}]   ;;  %s1722_s3 = inlined_call_operand.hbm [shape: f32[32,96], index: 3, kind: input, shape index: {}]   ;;  %s1723_s4 = inlined_call_operand.vmem [shape: f32[1,96], index: 4, kind: input, shape index: {}]   ;;  %s1724_s5 = inlined_call_operand.hbm [shape: f32[32,32], index: 5, kind: input, shape index: {}]   ;;  %s1725_s6 = inlined_call_operand.vmem [shape: f32[1,32], index: 6, kind: input, shape index: {}]   ;;  %s1726_s7 = inlined_call_operand.hbm [shape: f32[2,8,32], index: 7, kind: output, shape index: {}]  }
   0x1   :  { %1727 = sst [smem:[#allocation15_spill]] %s1720_s1 }
   0x2   :  { %12 = vsyncpa [#allocation3], 0 }
   0x3   :  { %14 = vsyncpa [#allocation3 + $0x1], 0 }
   0x4   :  { %15 = vsyncpa [#allocation6], 0 }
   0x5   :  { %16 = vsyncpa [#allocation9], 0 }
   0x6   :  { %17 = vsyncpa [#allocation4], 0 }
   0x7   :  { %19 = vsyncpa [#allocation4 + $0x1], 0  ;;  %s1467_s24 = smov 0   ;;  %s1469_s25 = smov 0  }
   0x8   :  { %s1471_s26 = smov 0   ;;  %s1473_s27 = smov 0  }
   0x9 LB: > { %s1488_s28 = sadd.s32 4294967295, %s1405_s27   ;;  %s1045_s29 = sadd.s32 4294967294, %s1405_s27   ;;  %s1405_s27 = sphi %s1473_s27, %s1739_s27   ;;  %s1401_s26 = sphi %s1471_s26, %s1738_s26   ;;  %s1397_s25 = sphi %s1469_s25, %s1737_s25   ;;  %s1393_s24 = sphi %s1467_s24, %s1736_s24  }
   0xa   : > { %p45_p0 = scmp.ne.s32.totalorder %s1397_s25, %s1393_s24  ;;  %p46_p1 = scmp.eq.s32.totalorder %s1488_s28, 0 }
   0xb   : > { %p195_p2 = scmp.eq.s32.totalorder %s1488_s28, 1  ;;  %p201_p3 = scmp.eq.s32.totalorder %s1045_s29, 1 }
   0xc   : > { %p1497_p4 = por %p46_p1, %p45_p0  ;;  %p1046_p5 = scmp.ge.s32.totalorder %s1405_s27, 1 }
   0xd   : > { %p1502_p6 = por %p201_p3, %p45_p0  ;;  %p208_p7 = scmp.lt.s32.totalorder %s1405_s27, 3 }
   0xe   : > { %s1730_s1 = sld [smem:[#allocation15_spill]]  ;;  %s1407_s13 = smov [#allocation5]  }
   0xf   : > { %p1510_p8 = pnand %p1046_p5, %p208_p7  ;;  %s222_s14 = sshll.u32 %s1407_s13, 4  ;;  %s223_s14 = int_to_ptr.vmem [resolvable:$true] %s222_s14 }
  0x10   : > { %s234_s17 = sshll.u32 %s1722_s3, 4  ;;  %s1408_s19 = smov [#allocation7]   ;;  %s235_s17 = int_to_ptr.hbm [resolvable:$true] %s234_s17 }
  0x11   : > { %p1093_p10 = pneg %p1510_p8  ;;  %s236_s20 = sshll.u32 %s1408_s19, 4  ;;  %s237_s20 = int_to_ptr.vmem [resolvable:$true] %s236_s20 }
  0x12   : > { %s1409_s21 = smov 128   ;;  %s1410_s22 = smov 8  }
  0x13   : > { %p1522_p11 = pnand %p1093_p10, %p46_p1  ;;  %s251_s9 = sshll.u32 %s1724_s5, 4  ;;  %s252_s9 = int_to_ptr.hbm [resolvable:$true] %s251_s9 }
  0x14   : > { %s220_s11 = sshll.u32 %s1730_s1, 4  ;;  %s1411_s10 = smov [#allocation8]   ;;  %s221_s11 = int_to_ptr.hbm [resolvable:$true] %s220_s11 }
  0x15   : > { %1096 = dma.hbm_to_vmem [thread:$0]  (!%p1522_p11), %s221_s11, 16, %s223_s14, [#allocation6]  }
  0x16   : > { %1099 = dma.hbm_to_vmem [thread:$0]  (!%p1522_p11), %s235_s17, 512, %s237_s20, [#allocation6], %s1409_s21, %s1409_s21, %s1410_s22  }
  0x17   : > { %s253_s13 = sshll.u32 %s1411_s10, 4  ;;  %s1536_s11 = sadd.s32 1, %s1405_s27   ;;  %s254_s13 = int_to_ptr.vmem [resolvable:$true] %s253_s13 }
  0x18   : > { %1102 = dma.hbm_to_vmem [thread:$0]  (!%p1522_p11), %s252_s9, 512, %s254_s13, [#allocation9], %s1409_s21, %s1409_s21, %s1410_s22  }
  0x19   : > { %s29_s14 = ssub.s32 %s1405_s27, %s1536_s11  ;;  %s32_s15 = sadd.s32 1, %s1401_s26 }
  0x1a   : > { %p30_p12 = scmp.eq.s32.totalorder %s29_s14, 0  ;;  %p39_p13 = scmp.ne.s32.totalorder %s1401_s26, %s1397_s25 }
  0x1b   : > { %p40_p0 = scmp.eq.s32.totalorder %s1405_s27, 0  ;;  %p1114_p5 = scmp.lt.s32.totalorder %s1405_s27, 2 }
  0x1c   : > { %s1545_s16 = scalar_select %p30_p12, %s1401_s26, %s32_s15  }
  0x1d   : > { %p1549_p3 = por %p195_p2, %p39_p13  ;;  %s270_s19 = sand.u32 1, %s1401_s26  }
  0x1e   : > { %s1052_s20 = sshll.u32 %s1405_s27, 3  ;;  %p41_p7 = por %p40_p0, %p39_p13 }
  0x1f   : > { %s1051_s18 = sshll.u32 %s270_s19, 3  ;;  %s278_s23 = scalar_lea.hbm %s1719_s0, %s1052_s20 }
  0x20   : > { %s280_s29 = sshll.u32 %s278_s23, 4  ;;  %s274_s9 = scalar_lea.vmem [#allocation2], %s1051_s18  ;;  %s281_s29 = int_to_ptr.hbm [resolvable:$true] %s280_s29 }
  0x21   : > { %s282_s10 = sshll.u32 %s274_s9, 4  ;;  %p1559_p10 = pnand %p1114_p5, %p41_p7  ;;  %s283_s10 = int_to_ptr.vmem [resolvable:$true] %s282_s10 }
  0x22   : > { %s271_s14 = scalar_lea.sflag [#allocation3], %s270_s19  ;;  %s1301_s15 = sshra.s32 %s281_s29, 4  ;;  %s1302_s15 = int_to_ptr.hbm [resolvable:$true] %s1301_s15 }
  0x23   : > { %s1303_s1 = scalar_lea.hbm %s1302_s15, 8  ;;  %p1305_p11 = pneg %p1559_p10 }
  0x24   : > { %p1304_p2 = scmp.ne.s32.totalorder %s1302_s15, %s1303_s1  ;;  %s1308_s18 = scalar_lea.hbm %s1719_s0, 16 }
  0x25   : > { %p1309_p0 = scmp.lt.s32.totalorder %s1302_s15, %s1719_s0  ;;  %p1310_p5 = scmp.lt.s32.totalorder %s1308_s18, %s1303_s1 }
  0x26   : > { %p1306_p12 = pnand %p1305_p11, %p1304_p2 }
  0x27   : > { %p1311_p7 = por %p1310_p5, %p1309_p0 }
  0x28   : > { %p1307_p13 = pneg %p1306_p12 }
  0x2a   : > { %p1312_p9 = pnand %p1311_p7, %p1307_p13 }
  0x2c   : > { %1315 = shalt.err (!%p1312_p9)
}
  0x2d   : > { %1106 = dma.hbm_to_vmem [thread:$0]  (!%p1559_p10), %s281_s29, 128, %s283_s10, %s271_s14  }
  0x2e   : > { %291 = sbr.rel (%p1510_p8) target bundleno = 1621 (0x655), region = 48  ;;  %s1576_s19 = sand.u32 (!%p1510_p8), 1, %s1397_s25  }
  0x2f   : > { %s1054_s9 = sshll.u32 (!%p1510_p8), %s1576_s19, 3  ;;  %s294_s20 = scalar_lea.sflag (!%p1510_p8), [#allocation3], %s1576_s19 }
  0x30   : > { %s297_s1 = scalar_lea.vmem (!%p1510_p8), [#allocation2], %s1054_s9 }
  0x33   : > { %1376 = dma.done.wait (%p1497_p4), %s294_s20, 128  }
  0x34   : > { %1378 = vsyncadd (%p1497_p4), %s294_s20, 4294967168 }
  0x35   : > { %1380 = dma.done.wait (%p46_p1), [#allocation6], 528  }
  0x36   : > { %1382 = vsyncadd (%p46_p1), [#allocation6], 4294966768 }
  0x37   : > { %1384 = dma.done.wait (%p46_p1), [#allocation9], 512  }
  0x38   : > { %1386 = vsyncadd (%p46_p1), [#allocation9], 4294966784  ;;  %vm345_vm0 = vcmask 261120   ;;  %v1594_v0 = vld [vmem:[%s297_s1] sm:$0xff]  ;;  %v1412_v2 = vmov 32.0   ;;  %v385_v17 = vld [vmem:[#allocation7] sm:$0xff] }
  0x39   : > { %v346_v1 = vsel %vm345_vm0, %v1594_v0, 0.0  ;;  %1175 = vrcp.f32 %v1412_v2  ;;  %v388_v14 = vld [vmem:[#allocation7 + $0x18] sm:$0xff]  ;;  %v387_v15 = vld [vmem:[#allocation7 + $0x10] sm:$0xff]  ;;  %v386_v16 = vld [vmem:[#allocation7 + $0x8] sm:$0xff]  ;;  %s1413_s13 = smov 72   ;;  %s1414_s14 = smov 120  }
  0x3a   : > { %347 = vadd.xlane.f32.xlu0 %v346_v1  ;;  %408 = vmatpush.msra.mxu0 %v388_v14  ;;  %v1171_v27 = vld [vmem:[#allocation5] ss:$0 sm:$0xff]  ;;  %v1172_v30 = vld [vmem:[%s1721_s2] ss:$0 sm:$0xff]  ;;  %s1415_s15 = smov 96   ;;  %s1416_s21 = smov 80  }
  0x3b   : > { %v1173_v33 = vld [vmem:[%s1723_s4] ss:$0 sm:$0xff]  ;;  %s1417_s18 = smov 88   ;;  %s1418_s22 = smov 104   ;;  %vm417_vm5 = vcmask 64512  }
  0x3c   : > { %409 = vmatpush.msra.mxu0 %v387_v15  ;;  %s1419_s23 = smov 112   ;;  %s1420_s20 = smov 56  }
  0x3d   : > { %s1421_s1 = smov 48   ;;  %s1422_s30 = smov 64  }
  0x3e   : > { %410 = vmatpush.msra.mxu0 %v386_v16  ;;  %s1423_s12 = smov 40   ;;  %s1424_s29 = smov 8  }
  0x3f   : > { %v1176_v3 = vpop.eup %1175  ;;  %s1425_s10 = smov 16  }
  0x40   : > { %v350_v4 = vmul.f32 32.0, %v1176_v3  ;;  %vm354_vm1 = vweird.f32 %v1176_v3  ;;  %411 = vmatpush.msra.mxu0 %v385_v17 }
  0x42   : > { %v351_v5 = vsub.f32 1.0, %v350_v4 }
  0x44   : > { %v352_v6 = vmul.f32 %v1176_v3, %v351_v5 }
  0x46   : > { %v353_v7 = vadd.f32 %v1176_v3, %v352_v6 }
  0x48   : > { %v355_v8 = vsel %vm354_vm1, %v1176_v3, %v353_v7 }
  0xad   : > { %v348_v9 = vpop.xlane.xlu0 %347 }
  0xae   : > { %v356_v10 = vmul.f32 %v355_v8, %v348_v9 }
  0xb0   : > { %v357_v11 = vsub.f32 %v1594_v0, %v356_v10 }
  0xb2   : > { %v358_v12 = vmul.f32 %v357_v11, %v357_v11 }
  0xb4   : > { %v359_v13 = vsel %vm345_vm0, %v358_v12, 0.0 }
  0xb5   : > { %360 = vadd.xlane.f32.xlu0 %v359_v13 }
 0x128   : > { %v361_v18 = vpop.xlane.xlu0 %360 }
 0x129   : > { %v362_v19 = vmul.f32 %v361_v18, %v355_v8 }
 0x12b   : > { %v363_v20 = vadd.f32 1e-05, %v362_v19 }
 0x12d   : > { %1177 = vrsqrt.f32 %v363_v20  ;;  %vm370_vm3 = vweird.f32 %v363_v20 }
 0x133   : > { %v1178_v21 = vpop.eup %1177 }
 0x134   : > { %v365_v22 = vmul.f32 %v1178_v21, %v363_v20  ;;  %vm371_vm2 = vweird.f32 %v1178_v21 }
 0x135   : > { %vm372_vm4 = vmor %vm370_vm3, %vm371_vm2 }
 0x136   : > { %v366_v23 = vmul.f32 %v1178_v21, %v365_v22 }
 0x138   : > { %v367_v24 = vmul.f32 0.5, %v366_v23 }
 0x13a   : > { %v368_v25 = vsub.f32 1.5, %v367_v24 }
 0x13c   : > { %v369_v26 = vmul.f32 %v1178_v21, %v368_v25 }
 0x13e   : > { %v373_v28 = vsel %vm372_vm4, %v1178_v21, %v369_v26 }
 0x13f   : > { %v374_v29 = vmul.f32 %v373_v28, %v357_v11 }
 0x141   : > { %v379_v31 = vmul.f32 %v1171_v27, %v374_v29 }
 0x143   : > { %v384_v32 = vadd.f32 %v1172_v30, %v379_v31 }
 0x145   : > { %1059 = vmatmul.msk.f32.vlgmr.msra.gmra.mxu0 %vm345_vm0, %v384_v32 }
 0x1c2   : > { %v413_v34 = vpop.f32.mrf.mxu0 }
 0x1c3   : > { %v1607_v35 = vadd.f32 %v1173_v33, %v413_v34 }
 0x1c5   : > { %v416_v36 = vmul.f32 %v1607_v35, %v1607_v35 }
 0x1c7   : > { %781 = vrot.lane.b32.xlu0 %v416_v36, %s1413_s13  ;;  %531 = vrot.lane.b32.xlu2 %v416_v36, %s1414_s14  ;;  %v418_v39 = vsel %vm417_vm5, %v416_v36, 0.0 }
 0x1c8   : > { %434 = vrot.lane.b32.xlu1 %v416_v36, %s1415_s15 }
 0x1cf   : > { %665 = vrot.lane.b32.xlu2 %v416_v36, %s1416_s21 }
 0x1d0   : > { %549 = vrot.lane.b32.xlu1 %v416_v36, %s1417_s18 }
 0x1d7   : > { %763 = vrot.lane.b32.xlu2 %v416_v36, %s1418_s22 }
 0x1d8   : > { %647 = vrot.lane.b32.xlu1 %v416_v36, %s1419_s23 }
 0x221   : > { %v532_v37 = vpop.permute.xlu2 %531 }
 0x222   : > { %v534_v38 = vsel %vm417_vm5, %v532_v37, 0.0 }
 0x223   : > { %535 = vadd.xlane.f32.xlu0 %v534_v38 }
 0x229   : > { %v666_v42 = vpop.permute.xlu2 %665 }
 0x22a   : > { %v668_v49 = vsel %vm417_vm5, %v666_v42, 0.0 }
 0x22b   : > { %419 = vadd.xlane.f32.xlu0 %v418_v39 }
 0x231   : > { %v764_v47 = vpop.permute.xlu2 %763 }
 0x232   : > { %v766_v48 = vsel %vm417_vm5, %v764_v47, 0.0 }
 0x239   : > { %v782_v43 = vpop.permute.xlu0 %781 }
 0x23a   : > { %v435_v40 = vpop.permute.xlu1 %434  ;;  %v784_v45 = vsel %vm417_vm5, %v782_v43, 0.0 }
 0x23b   : > { %v437_v41 = vsel %vm417_vm5, %v435_v40, 0.0 }
 0x23c   : > { %438 = vadd.xlane.f32.xlu1 %v437_v41 }
 0x242   : > { %v550_v44 = vpop.permute.xlu1 %549 }
 0x243   : > { %v552_v46 = vsel %vm417_vm5, %v550_v44, 0.0 }
 0x244   : > { %785 = vadd.xlane.f32.xlu1 %v784_v45  ;;  %553 = vadd.xlane.f32.xlu2 %v552_v46 }
 0x24a   : > { %v648_v50 = vpop.permute.xlu1 %647 }
 0x24b   : > { %v650_v51 = vsel %vm417_vm5, %v648_v50, 0.0 }
 0x24c   : > { %767 = vadd.xlane.f32.xlu1 %v766_v48  ;;  %669 = vadd.xlane.f32.xlu2 %v668_v49 }
 0x254   : > { %651 = vadd.xlane.f32.xlu2 %v650_v51 }
 0x296   : > { %v536_v52 = vpop.xlane.xlu0 %535 }
 0x297   : > { %v537_v53 = vmax.f32 %v536_v52, 1e-24 }
 0x299   : > { %1179 = vrsqrt.f32 %v537_v53  ;;  %vm544_vm7 = vweird.f32 %v537_v53 }
 0x29f   : > { %v1180_v54 = vpop.eup %1179 }
 0x2a0   : > { %v539_v55 = vmul.f32 %v1180_v54, %v537_v53  ;;  %vm545_vm6 = vweird.f32 %v1180_v54 }
 0x2a1   : > { %vm546_vm8 = vmor %vm544_vm7, %vm545_vm6 }
 0x2a2   : > { %v540_v56 = vmul.f32 %v1180_v54, %v539_v55 }
 0x2a4   : > { %v541_v57 = vmul.f32 0.5, %v540_v56 }
 0x2a6   : > { %v542_v58 = vsub.f32 1.5, %v541_v57 }
 0x2a8   : > { %v543_v59 = vmul.f32 %v1180_v54, %v542_v58 }
 0x2aa   : > { %v547_v60 = vsel %vm546_vm8, %v1180_v54, %v543_v59 }
 0x2ab   : > { %v548_v61 = vmul.f32 %v547_v60, %v1607_v35  ;;  %v420_v60 = vpop.xlane.xlu0 %419 }
 0x2ad   : > { %568 = vrot.lane.b32.xlu0 %v548_v61, %s1414_s14  ;;  %v421_v61 = vmax.f32 %v420_v60, 1e-24  ;;  %s1074_s14 = sshll.u32 %s1488_s28, 3  ;;  %s931_s28 = scalar_lea.sflag [#allocation4], %s1576_s19 }
 0x2af   : > { %v439_v62 = vpop.xlane.xlu1 %438 }
 0x2b0   : > { %v440_v63 = vmax.f32 %v439_v62, 1e-24 }
 0x2b2   : > { %1181 = vrsqrt.f32 %v440_v63  ;;  %vm447_vm10 = vweird.f32 %v440_v63 }
 0x2b7   : > { %v554_v1 = vpop.xlane.xlu2 %553  ;;  %v786_v2 = vpop.xlane.xlu1 %785 }
 0x2b8   : > { %v1182_v3 = vpop.eup %1181  ;;  %v555_v4 = vmax.f32 %v554_v1, 1e-24  ;;  %v787_v5 = vmax.f32 %v786_v2, 1e-24 }
 0x2b9   : > { %v442_v6 = vmul.f32 %v1182_v3, %v440_v63  ;;  %vm448_vm9 = vweird.f32 %v1182_v3 }
 0x2ba   : > { %1183 = vrsqrt.f32 %v555_v4  ;;  %vm449_vm11 = vmor %vm447_vm10, %vm448_vm9  ;;  %vm562_vm13 = vweird.f32 %v555_v4  ;;  %vm794_vm1 = vweird.f32 %v787_v5 }
 0x2bb   : > { %v443_v7 = vmul.f32 %v1182_v3, %v442_v6  ;;  %1185 = vrsqrt.f32 %v787_v5 }
 0x2bd   : > { %v444_v8 = vmul.f32 0.5, %v443_v7 }
 0x2bf   : > { %v445_v9 = vsub.f32 1.5, %v444_v8  ;;  %v670_v10 = vpop.xlane.xlu2 %669  ;;  %v768_v11 = vpop.xlane.xlu1 %767 }
 0x2c0   : > { %v1184_v12 = vpop.eup %1183  ;;  %v671_v13 = vmax.f32 %v670_v10, 1e-24  ;;  %v769_v14 = vmax.f32 %v768_v11, 1e-24 }
 0x2c1   : > { %v1186_v15 = vpop.eup %1185  ;;  %v557_v16 = vmul.f32 %v1184_v12, %v555_v4  ;;  %v446_v17 = vmul.f32 %v1182_v3, %v445_v9  ;;  %vm563_vm12 = vweird.f32 %v1184_v12 }
 0x2c2   : > { %v789_v18 = vmul.f32 %v1186_v15, %v787_v5  ;;  %1187 = vrsqrt.f32 %v671_v13  ;;  %vm795_vm14 = vweird.f32 %v1186_v15  ;;  %vm564_vm15 = vmor %vm562_vm13, %vm563_vm12  ;;  %vm678_vm4 = vweird.f32 %v671_v13 }
 0x2c3   : > { %v558_v19 = vmul.f32 %v1184_v12, %v557_v16  ;;  %1189 = vrsqrt.f32 %v769_v14  ;;  %v450_v20 = vsel %vm449_vm11, %v1182_v3, %v446_v17  ;;  %vm796_vm2 = vmor %vm794_vm1, %vm795_vm14  ;;  %vm776_vm8 = vweird.f32 %v769_v14 }
 0x2c4   : > { %v790_v21 = vmul.f32 %v1186_v15, %v789_v18  ;;  %v451_v22 = vmul.f32 %v450_v20, %v1607_v35  ;;  %vm428_vm14 = vweird.f32 %v421_v61 }
 0x2c5   : > { %v559_v23 = vmul.f32 0.5, %v558_v19 }
 0x2c6   : > { %v791_v24 = vmul.f32 0.5, %v790_v21  ;;  %453 = vrot.lane.b32.xlu2 %v451_v22, %s1415_s15 }
 0x2c7   : > { %v560_v25 = vsub.f32 1.5, %v559_v23  ;;  %v652_v26 = vpop.xlane.xlu2 %651 }
 0x2c8   : > { %v1188_v27 = vpop.eup %1187  ;;  %v792_v28 = vsub.f32 1.5, %v791_v24  ;;  %v653_v29 = vmax.f32 %v652_v26, 1e-24 }
 0x2c9   : > { %v1190_v30 = vpop.eup %1189  ;;  %v673_v31 = vmul.f32 %v1188_v27, %v671_v13  ;;  %v561_v32 = vmul.f32 %v1184_v12, %v560_v25  ;;  %vm679_vm3 = vweird.f32 %v1188_v27 }
 0x2ca   : > { %v771_v33 = vmul.f32 %v1190_v30, %v769_v14  ;;  %1191 = vrsqrt.f32 %v653_v29  ;;  %v793_v37 = vmul.f32 %v1186_v15, %v792_v28  ;;  %vm680_vm6 = vmor %vm678_vm4, %vm679_vm3  ;;  %vm777_vm7 = vweird.f32 %v1190_v30 }
 0x2cb   : > { %v674_v34 = vmul.f32 %v1188_v27, %v673_v31  ;;  %v565_v36 = vsel %vm564_vm15, %v1184_v12, %v561_v32  ;;  %vm778_vm10 = vmor %vm776_vm8, %vm777_vm7  ;;  %vm660_vm11 = vweird.f32 %v653_v29  ;;  %1193 = vrsqrt.f32 %v421_v61 }
 0x2cc   : > { %v772_v38 = vmul.f32 %v1190_v30, %v771_v33  ;;  %v566_v39 = vmul.f32 %v565_v36, %v1607_v35  ;;  %v797_v41 = vsel %vm796_vm2, %v1186_v15, %v793_v37 }
 0x2cd   : > { %v675_v40 = vmul.f32 0.5, %v674_v34  ;;  %v798_v43 = vmul.f32 %v797_v41, %v1607_v35 }
 0x2ce   : > { %v773_v42 = vmul.f32 0.5, %v772_v38  ;;  %571 = vrot.lane.b32.xlu1 %v566_v39, %s1417_s18  ;;  %s941_s18 = scalar_lea.hbm %s1726_s7, %s1074_s14 }
 0x2cf   : > { %v676_v44 = vsub.f32 1.5, %v675_v40  ;;  %803 = vrot.lane.b32.xlu0 %v798_v43, %s1413_s13  ;;  %s1426_s13 = smov 24  }
 0x2d0   : > { %v1192_v45 = vpop.eup %1191  ;;  %v774_v46 = vsub.f32 1.5, %v773_v42 }
 0x2d1   : > { %v655_v47 = vmul.f32 %v1192_v45, %v653_v29  ;;  %v677_v48 = vmul.f32 %v1188_v27, %v676_v44  ;;  %vm661_vm9 = vweird.f32 %v1192_v45  ;;  %v1194_v62 = vpop.eup %1193 }
 0x2d2   : > { %v775_v53 = vmul.f32 %v1190_v30, %v774_v46  ;;  %vm662_vm12 = vmor %vm660_vm11, %vm661_vm9  ;;  %v423_v63 = vmul.f32 %v1194_v62, %v421_v61  ;;  %vm429_vm13 = vweird.f32 %v1194_v62 }
 0x2d3   : > { %v656_v49 = vmul.f32 %v1192_v45, %v655_v47  ;;  %v681_v50 = vsel %vm680_vm6, %v1188_v27, %v677_v48  ;;  %vm430_vm15 = vmor %vm428_vm14, %vm429_vm13 }
 0x2d4   : > { %v682_v51 = vmul.f32 %v681_v50, %v1607_v35  ;;  %v779_v56 = vsel %vm778_vm10, %v1190_v30, %v775_v53  ;;  %v424_v1 = vmul.f32 %v1194_v62, %v423_v63 }
 0x2d5   : > { %v657_v52 = vmul.f32 0.5, %v656_v49  ;;  %v780_v59 = vmul.f32 %v779_v56, %v1607_v35 }
 0x2d6   : > { %687 = vrot.lane.b32.xlu2 %v682_v51, %s1416_s21  ;;  %v425_v2 = vmul.f32 0.5, %v424_v1 }
 0x2d7   : > { %v658_v54 = vsub.f32 1.5, %v657_v52 }
 0x2d8   : > { %v426_v3 = vsub.f32 1.5, %v425_v2 }
 0x2d9   : > { %v659_v55 = vmul.f32 %v1192_v45, %v658_v54 }
 0x2da   : > { %v427_v4 = vmul.f32 %v1194_v62, %v426_v3 }
 0x2db   : > { %v663_v57 = vsel %vm662_vm12, %v1192_v45, %v659_v55 }
 0x2dc   : > { %v664_v58 = vmul.f32 %v663_v57, %v1607_v35  ;;  %v431_v5 = vsel %vm430_vm15, %v1194_v62, %v427_v4 }
 0x2dd   : > { %v432_v7 = vmul.f32 %v431_v5, %v1607_v35 }
 0x2de   : > { %684 = vrot.lane.b32.xlu1 %v664_v58, %s1419_s23  ;;  %800 = vrot.lane.b32.xlu2 %v780_v59, %s1418_s22 }
 0x31f   : > { %v569_v9 = vpop.permute.xlu0 %568 }
 0x320   : > { %v454_v6 = vpop.permute.xlu2 %453 }
 0x321   : > { %1060 = vmatpush.xpose.msk.msra.mxu1 %vm417_vm5, %v454_v6 }
 0x324   : > { %1061 = vmatmul.msk.f32.vlgmr.msra.gmra.mxu1 %vm417_vm5, %v432_v7 }
 0x330   : > { %v688_v8 = vpop.permute.xlu2 %687 }
 0x331   : > { %1066 = vmatpush.xpose.msk.msrb.mxu1 %vm417_vm5, %v688_v8 }
 0x338   : > { %v801_v12 = vpop.permute.xlu2 %800 }
 0x340   : > { %v572_v10 = vpop.permute.xlu1 %571 }
 0x341   : > { %1063 = vmatpush.xpose.msk.msra.mxu3 %vm417_vm5, %v572_v10  ;;  %v804_v11 = vpop.permute.xlu0 %803 }
 0x342   : > { %1069 = vmatpush.xpose.msk.msrb.mxu0 %vm417_vm5, %v804_v11 }
 0x344   : > { %1064 = vmatmul.msk.f32.vlgmr.msra.gmra.mxu3 %vm417_vm5, %v569_v9 }
 0x345   : > { %1070 = vmatmul.msk.f32.vlgmr.msrb.gmra.mxu0 %vm417_vm5, %v801_v12 }
 0x350   : > { %v685_v13 = vpop.permute.xlu1 %684 }
 0x351   : > { %1067 = vmatmul.msk.f32.vlgmr.msrb.gmra.mxu1 %vm417_vm5, %v685_v13 }
 0x3a1   : > { %v477_v14 = vpop.f32.mrf.mxu1 }
 0x3a2   : > { %v480_v15 = vsel %vm417_vm5, %v477_v14, -inf }
 0x3a3   : > { %481 = vmax.xlane.f32.xlu0 %v480_v15 }
 0x3c2   : > { %v826_v16 = vpop.f32.mrf.mxu0 }
 0x3c3   : > { %v829_v17 = vsel %vm417_vm5, %v826_v16, -inf }
 0x3c4   : > { %830 = vmax.xlane.f32.xlu0 %v829_v17 }
 0x3c7   : > { %v594_v18 = vpop.f32.mrf.mxu3 }
 0x3c8   : > { %v597_v19 = vsel %vm417_vm5, %v594_v18, -inf }
 0x3c9   : > { %598 = vmax.xlane.f32.xlu1 %v597_v19 }
 0x3ce   : > { %v710_v20 = vpop.f32.mrf.mxu1 }
 0x3cf   : > { %v713_v21 = vsel %vm417_vm5, %v710_v20, -inf }
 0x3d0   : > { %714 = vmax.xlane.f32.xlu2 %v713_v21 }
 0x3d8   : > { %621 = vrot.lane.b32.xlu0 %v1607_v35, %s1420_s20  ;;  %s343_s20 = scalar_lea.vmem [#allocation10], %s1054_s9  ;;  %s1351_s9 = scalar_lea.hbm %s1726_s7, 16 }
 0x416   : > { %v482_v22 = vpop.xlane.xlu0 %481 }
 0x417   : > { %v483_v23 = vsub.f32 %v477_v14, %v482_v22 }
 0x419   : > { %v484_v24 = vmul.f32 1.442695, %v483_v23 }
 0x41b   : > { %1195 = vpow2.f32 %v484_v24 }
 0x421   : > { %v1196_v25 = vpop.eup %1195 }
 0x422   : > { %v486_v26 = vsel %vm417_vm5, %v1196_v25, 0.0 }
 0x423   : > { %487 = vadd.xlane.f32.xlu1 %v486_v26 }
 0x437   : > { %v831_v27 = vpop.xlane.xlu0 %830 }
 0x438   : > { %v832_v28 = vsub.f32 %v826_v16, %v831_v27 }
 0x43a   : > { %v833_v29 = vmul.f32 1.442695, %v832_v28 }
 0x43c   : > { %v599_v30 = vpop.xlane.xlu1 %598  ;;  %1197 = vpow2.f32 %v833_v29 }
 0x43d   : > { %v600_v31 = vsub.f32 %v594_v18, %v599_v30 }
 0x43f   : > { %v601_v32 = vmul.f32 1.442695, %v600_v31 }
 0x441   : > { %1199 = vpow2.f32 %v601_v32 }
 0x442   : > { %v1655_v33 = vpop.eup %1197 }
 0x443   : > { %v715_v34 = vpop.xlane.xlu2 %714  ;;  %v835_v37 = vsel %vm417_vm5, %v1655_v33, 0.0 }
 0x444   : > { %v716_v36 = vsub.f32 %v710_v20, %v715_v34  ;;  %836 = vadd.xlane.f32.xlu1 %v835_v37  ;;  %v899_v37 = vld [vmem:[#allocation8 + $0x18] sm:$0xff] }
 0x445   : > { %915 = vmatpush.msra.mxu1 %v899_v37 }
 0x446   : > { %v717_v38 = vmul.f32 1.442695, %v716_v36 }
 0x447   : > { %v1659_v39 = vpop.eup %1199 }
 0x448   : > { %1201 = vpow2.f32 %v717_v38  ;;  %v603_v40 = vsel %vm417_vm5, %v1659_v39, 0.0  ;;  %v898_v38 = vld [vmem:[#allocation8 + $0x10] sm:$0xff] }
 0x449   : > { %604 = vadd.xlane.f32.xlu2 %v603_v40  ;;  %916 = vmatpush.msra.mxu1 %v898_v38 }
 0x44a   : > { %v622_v50 = vpop.permute.xlu0 %621 }
 0x44e   : > { %v1663_v41 = vpop.eup %1201 }
 0x44f   : > { %v719_v42 = vsel %vm417_vm5, %v1663_v41, 0.0 }
 0x450   : > { %720 = vadd.xlane.f32.xlu0 %v719_v42 }
 0x45d   : > { %737 = vrot.lane.b32.xlu1 %v1607_v35, %s1421_s1  ;;  %s943_s1 = sshll.u32 %s343_s20, 4  ;;  %s944_s1 = int_to_ptr.vmem [resolvable:$true] %s943_s1 }
 0x461   : > { %505 = vrot.lane.b32.xlu2 %v1607_v35, %s1422_s30  ;;  %s945_s30 = sshll.u32 %s941_s18, 4  ;;  %s946_s30 = int_to_ptr.hbm [resolvable:$true] %s945_s30 }
 0x464   : > { %853 = vrot.lane.b32.xlu0 %v1607_v35, %s1423_s12  ;;  %s1345_s12 = sshra.s32 %s946_s30, 4  ;;  %s1346_s12 = int_to_ptr.hbm [resolvable:$true] %s1345_s12 }
 0x465   : > { %p1352_p9 = scmp.lt.s32.totalorder %s1346_s12, %s1726_s7 }
 0x496   : > { %v488_v43 = vpop.xlane.xlu1 %487 }
 0x497   : > { %1203 = vrcp.f32 %v488_v43  ;;  %v500_v51 = vand.u32 2147483648, %v488_v43  ;;  %vm494_vm2 = vweird.f32 %v488_v43  ;;  %v498_v53 = vand.u32 2147483647, %v488_v43 }
 0x499   : > { %v501_v35 = vor.u32 1.1754944e-38, %v500_v51  ;;  %vm499_vm4 = vcmp.eq.f32.partialorder %v498_v53, 8.507059e+37 }
 0x49d   : > { %v1204_v44 = vpop.eup %1203 }
 0x49e   : > { %v490_v45 = vmul.f32 %v1204_v44, %v488_v43  ;;  %vm495_vm1 = vweird.f32 %v1204_v44 }
 0x49f   : > { %vm496_vm3 = vmor %vm494_vm2, %vm495_vm1 }
 0x4a0   : > { %v491_v46 = vsub.f32 1.0, %v490_v45 }
 0x4a2   : > { %v492_v47 = vmul.f32 %v1204_v44, %v491_v46  ;;  %v1174_v46 = vld [vmem:[%s1725_s6] ss:$0 sm:$0xff] }
 0x4a4   : > { %v493_v49 = vadd.f32 %v1204_v44, %v492_v47 }
 0x4a6   : > { %v497_v54 = vsel %vm496_vm3, %v1204_v44, %v493_v49  ;;  %vm892_vm3 = vcmask 130048  }
 0x4a7   : > { %v502_v57 = vsel %vm499_vm4, %v501_v35, %v497_v54  ;;  %vm894_vm4 = vcmask 195584  }
 0x4a8   : > { %v503_v63 = vmul.f32 %v1196_v25, %v502_v57 }
 0x4b7   : > { %v837_v48 = vpop.xlane.xlu1 %836 }
 0x4b8   : > { %1205 = vrcp.f32 %v837_v48  ;;  %v849_v12 = vand.u32 2147483648, %v837_v48  ;;  %vm843_vm11 = vweird.f32 %v837_v48  ;;  %v847_v15 = vand.u32 2147483647, %v837_v48 }
 0x4ba   : > { %v850_v22 = vor.u32 1.1754944e-38, %v849_v12  ;;  %vm848_vm15 = vcmp.eq.f32.partialorder %v847_v15, 8.507059e+37 }
 0x4bc   : > { %v605_v52 = vpop.xlane.xlu2 %604 }
 0x4bd   : > { %1207 = vrcp.f32 %v605_v52  ;;  %v617_v2 = vand.u32 2147483648, %v605_v52  ;;  %v615_v5 = vand.u32 2147483647, %v605_v52  ;;  %vm611_vm7 = vweird.f32 %v605_v52 }
 0x4be   : > { %v1206_v55 = vpop.eup %1205 }
 0x4bf   : > { %v839_v56 = vmul.f32 %v1206_v55, %v837_v48  ;;  %v618_v8 = vor.u32 1.1754944e-38, %v617_v2  ;;  %vm844_vm9 = vweird.f32 %v1206_v55  ;;  %vm616_vm10 = vcmp.eq.f32.partialorder %v615_v5, 8.507059e+37 }
 0x4c0   : > { %vm845_vm12 = vmor %vm843_vm11, %vm844_vm9 }
 0x4c1   : > { %v840_v60 = vsub.f32 1.0, %v839_v56 }
 0x4c3   : > { %v1208_v58 = vpop.eup %1207  ;;  %v721_v59 = vpop.xlane.xlu0 %720  ;;  %v841_v3 = vmul.f32 %v1206_v55, %v840_v60 }
 0x4c4   : > { %v607_v61 = vmul.f32 %v1208_v58, %v605_v52  ;;  %1209 = vrcp.f32 %v721_v59  ;;  %v506_v62 = vpop.permute.xlu2 %505  ;;  %vm612_vm6 = vweird.f32 %v1208_v58  ;;  %v733_v16 = vand.u32 2147483648, %v721_v59 }
 0x4c5   : > { %526 = vmatpush.msra.mxu2 %v506_v62  ;;  %vm613_vm8 = vmor %vm611_vm7, %vm612_vm6  ;;  %v842_v10 = vadd.f32 %v1206_v55, %v841_v3  ;;  %v731_v19 = vand.u32 2147483647, %v721_v59  ;;  %vm727_vm14 = vweird.f32 %v721_v59 }
 0x4c6   : > { %v608_v1 = vsub.f32 1.0, %v607_v61  ;;  %1062 = vmatmul.msk.f32.vlgmr.msra.gmra.mxu2 %vm417_vm5, %v503_v63  ;;  %v734_v24 = vor.u32 1.1754944e-38, %v733_v16 }
 0x4c7   : > { %642 = vmatpush.msrb.mxu2 %v622_v50  ;;  %v846_v20 = vsel %vm845_vm12, %v1206_v55, %v842_v10  ;;  %vm732_vm2 = vcmp.eq.f32.partialorder %v731_v19, 8.507059e+37 }
 0x4c8   : > { %v609_v4 = vmul.f32 %v1208_v58, %v608_v1  ;;  %v851_v25 = vsel %vm848_vm15, %v850_v22, %v846_v20 }
 0x4c9   : > { %v852_v30 = vmul.f32 %v1655_v33, %v851_v25  ;;  %v897_v33 = vld [vmem:[#allocation8 + $0x8] sm:$0xff] }
 0x4ca   : > { %v1210_v6 = vpop.eup %1209  ;;  %v610_v7 = vadd.f32 %v1208_v58, %v609_v4  ;;  %917 = vmatpush.msra.mxu1 %v897_v33 }
 0x4cb   : > { %v723_v9 = vmul.f32 %v1210_v6, %v721_v59  ;;  %vm728_vm13 = vweird.f32 %v1210_v6 }
 0x4cc   : > { %v614_v11 = vsel %vm613_vm8, %v1208_v58, %v610_v7  ;;  %vm729_vm1 = vmor %vm727_vm14, %vm728_vm13 }
 0x4cd   : > { %v724_v13 = vsub.f32 1.0, %v723_v9  ;;  %v619_v14 = vsel %vm616_vm10, %v618_v8, %v614_v11 }
 0x4ce   : > { %v620_v17 = vmul.f32 %v1659_v39, %v619_v14  ;;  %v896_v39 = vld [vmem:[#allocation8] sm:$0xff] }
 0x4cf   : > { %v725_v18 = vmul.f32 %v1210_v6, %v724_v13  ;;  %v738_v21 = vpop.permute.xlu1 %737  ;;  %918 = vmatpush.msra.mxu1 %v896_v39 }
 0x4d0   : > { %1065 = vmatmul.msk.f32.vlgmr.msrb.gmra.mxu2 %vm417_vm5, %v620_v17  ;;  %758 = vmatpush.msrb.mxu3 %v738_v21 }
 0x4d1   : > { %v726_v23 = vadd.f32 %v1210_v6, %v725_v18 }
 0x4d3   : > { %v730_v26 = vsel %vm729_vm1, %v1210_v6, %v726_v23 }
 0x4d4   : > { %v735_v27 = vsel %vm732_vm2, %v734_v24, %v730_v26 }
 0x4d5   : > { %v736_v28 = vmul.f32 %v1663_v41, %v735_v27 }
 0x4d6   : > { %v854_v29 = vpop.permute.xlu0 %853 }
 0x4d7   : > { %1068 = vmatmul.msk.f32.vlgmr.msrb.gmra.mxu3 %vm417_vm5, %v736_v28  ;;  %874 = vmatpush.msra.mxu2 %v854_v29 }
 0x4d8   : > { %1071 = vmatmul.msk.f32.vlgmr.msra.gmra.mxu2 %vm417_vm5, %v852_v30 }
 0x549   : > { %v528_v31 = vpop.f32.mrf.mxu2 }
 0x553   : > { %v644_v32 = vpop.f32.mrf.mxu2 }
 0x554   : > { %880 = vrot.lane.b32.xlu2 %v644_v32, %s1424_s29  ;;  %s1347_s29 = scalar_lea.hbm %s1346_s12, 8 }
 0x555   : > { %p1348_p1 = scmp.ne.s32.totalorder %s1346_s12, %s1347_s29  ;;  %p1353_p10 = scmp.lt.s32.totalorder %s1351_s9, %s1347_s29 }
 0x557   : > { %p1349_p4 = pnand %p1348_p1, %p1549_p3  ;;  %p1354_p2 = por %p1353_p10, %p1352_p9 }
 0x559   : > { %p1350_p8 = pneg %p1349_p4 }
 0x55a   : > { %v760_v34 = vpop.f32.mrf.mxu3 }
 0x55b   : > { %884 = vrot.lane.b32.xlu1 %v760_v34, %s1425_s10  ;;  %v876_v36 = vpop.f32.mrf.mxu2  ;;  %p1355_p11 = pnand %p1354_p2, %p1350_p8 }
 0x55c   : > { %888 = vrot.lane.b32.xlu0 %v876_v36, %s1426_s13 }
 0x5ae   : > { %v881_v40 = vpop.permute.xlu2 %880 }
 0x5af   : > { %v891_v41 = vsel %vm417_vm5, %v528_v31, %v881_v40 }
 0x5cd   : > { %v885_v42 = vpop.permute.xlu1 %884 }
 0x5ce   : > { %v893_v43 = vsel %vm892_vm3, %v891_v41, %v885_v42  ;;  %v889_v44 = vpop.permute.xlu0 %888 }
 0x5cf   : > { %v895_v45 = vsel %vm894_vm4, %v893_v43, %v889_v44 }
 0x5d0   : > { %1072 = vmatmul.msk.f32.vlgmr.msra.gmra.mxu1 %vm345_vm0, %v895_v45 }
 0x64d   : > { %v920_v47 = vpop.f32.mrf.mxu1 }
 0x64e   : > { %v923_v48 = vadd.f32 %v920_v47, %v1594_v0 }
 0x650   : > { %v928_v49 = vadd.f32 %v1174_v46, %v923_v48 }
 0x652   : > { %929 = vst.msk [vmem:[%s343_s20] sm:$0xff] %vm345_vm0, %v928_v49 }
 0x653   : > { %1358 = shalt.err (!%p1355_p11)
}
 0x654   : > { %1091 = dma.vmem_to_hbm [thread:$0]  (%p1549_p3), %s944_s1, 128, %s946_s30, %s931_s28  }
 0x655 PF: > { %s957_s19 = sand.u32 1, %s1393_s24   ;;  %p1735_p12 = scmp.ge.s32.totalorder %s1405_s27, 2 }
 0x656   : > { %s958_s21 = scalar_lea.sflag [#allocation4], %s957_s19 }
 0x657   : > { %p1108_p13 = pnand %p1735_p12, %p1502_p6 }
 0x659   : > { %p1109_p0 = pneg %p1108_p13 }
 0x65b   : > { %1388 = dma.done.wait (%p1109_p0), %s958_s21, 128  }
 0x65c   : > { %1390 = vsyncadd (%p1109_p0), %s958_s21, 4294967168  ;;  %p22_p5 = scmp.ge.s32.totalorder %s1536_s11, 4   ;;  %s1736_s24 = smov %s1397_s25 }
 0x65d   : > { %s1737_s25 = smov %s1401_s26  ;;  %s1738_s26 = smov %s1545_s16 }
 0x65e   : > { %s1739_s27 = smov %s1536_s11  ;;  %24 = sbr.rel (!%p22_p5) target bundleno = 9 (0x9), region = 105 }
 0x663   :  { %964 = vsyncpa [#allocation3], 1 }
 0x664   :  { %966 = vsyncpa [#allocation3 + $0x1], 1 }
 0x665   :  { %967 = vsyncpa [#allocation6], 1 }
 0x666   :  { %968 = vsyncpa [#allocation9], 1 }
 0x667   :  { %969 = vsyncpa [#allocation4], 1 }
 0x668   :  { %971 = vsyncpa [#allocation4 + $0x1], 1 }

</bundles_post_ra>
